<compile_context>
chip_gen: v7x
topology: tpu7x:2x2x1
jax: 0.10.0
libtpu: 0.0.40
codegen_flags: <defaults>
</compile_context>

<pallas_src>
from functools import partial

import jax
import jax.numpy as jnp
from jax.experimental import pallas as pl
from jax.experimental.pallas import tpu as pltpu


def _col_shift(x, d):
    """Shift the folded-W (sublane) axis by one column.

    Returns y with y[..., wf, :] = x[..., wf - d, :] and zeros shifted in at the
    boundary (d = +1 -> 'previous column' view, d = -1 -> 'next column' view).
    Uses an XLU sublane roll + iota boundary mask when the axis is vreg-aligned,
    otherwise falls back to a zero-column concatenate.
    """
    Wf = x.shape[2]
    if Wf == 1:
        return jnp.zeros_like(x)
    if Wf % 8 == 0:
        y = pltpu.roll(x, shift=d % Wf, axis=2)
        wf_idx = jax.lax.broadcasted_iota(jnp.int32, x.shape, 2)
        edge = (wf_idx == 0) if d == 1 else (wf_idx == Wf - 1)
        return jnp.where(edge, jnp.zeros_like(x), y)
    zero = jnp.zeros(x.shape[:2] + (1,) + x.shape[3:], x.dtype)
    if d == 1:
        return jnp.concatenate([zero, x[:, :, :Wf - 1, :]], axis=2)
    return jnp.concatenate([x[:, :, 1:, :], zero], axis=2)


def _w_neighbors(x, g, ch):
    """Return (left, right) = input columns (w-1, w+1) with zeros at image borders.

    x has layout (1, T, Wf, g*ch) with w = wf*g + gi and lane = gi*ch + c.  For
    g == 1 the shift is a pure sublane shift; for g > 1 it is a lane roll by ch
    plus a sublane fixup only for the lanes that wrap across a column group.
    """
    if g == 1:
        return _col_shift(x, 1), _col_shift(x, -1)
    L = x.shape[3]
    lane = jax.lax.broadcasted_iota(jnp.int32, x.shape, 3)
    rolled_l = pltpu.roll(x, shift=ch, axis=3)         # source gi-1 (wraps within wf)
    left = jnp.where(lane < ch, _col_shift(rolled_l, 1), rolled_l)
    rolled_r = pltpu.roll(x, shift=L - ch, axis=3)     # source gi+1 (wraps within wf)
    right = jnp.where(lane >= L - ch, _col_shift(rolled_r, -1), rolled_r)
    return left, right


def _dwconv_kernel(x_ref, top_ref, bot_ref, w_ref, b_ref, o_ref, acc_ref, *, g, ch):
    # x_ref  : (1, TH, Wf, L)  main row tile
    # top_ref: (1, 1,  Wf, L)  row just above the tile (clamped index)
    # bot_ref: (1, 1,  Wf, L)  row just below the tile (clamped index)
    # w_ref  : (3, 3, L)       depthwise taps   b_ref: (1, L) bias
    # o_ref  : (1, TH, Wf, L)  acc_ref: f32 scratch of the same shape
    _, TH, Wf, L = o_ref.shape
    r = pl.program_id(2)
    n_r = pl.num_programs(2)

    w = w_ref[...].astype(jnp.float32)     # hoisted: loaded/cast once per grid step
    b = b_ref[...].astype(jnp.float32)

    xc = x_ref[...].astype(jnp.float32)    # single upfront cast; all taps in f32
    xl, xr = _w_neighbors(xc, g, ch)       # W-shifted views built once, reused per kh

    # kh = 0 (center row): initialize the accumulator with taps + bias (no zero fill).
    acc_ref[...] = xc * w[1, 1] + xl * w[1, 0] + xr * w[1, 2] + b

    if TH > 1:
        # kh = -1 (row above): output rows 1..TH-1 read tile rows 0..TH-2 (free offsets).
        acc_ref[:, 1:, :, :] = (acc_ref[:, 1:, :, :]
                                + xc[:, :TH - 1] * w[0, 1]
                                + xl[:, :TH - 1] * w[0, 0]
                                + xr[:, :TH - 1] * w[0, 2])
        # kh = +1 (row below): output rows 0..TH-2 read tile rows 1..TH-1.
        acc_ref[:, :TH - 1, :, :] = (acc_ref[:, :TH - 1, :, :]
                                     + xc[:, 1:] * w[2, 1]
                                     + xl[:, 1:] * w[2, 0]
                                     + xr[:, 1:] * w[2, 2])

    # Halo fixups: one extra row above/below the tile.  Skipped entirely at the image
    # borders (zero conv padding) - no materialized row masks.
    @pl.when(r > 0)
    def _add_top_halo():
        tc = top_ref[...].astype(jnp.float32)
        tl, tr = _w_neighbors(tc, g, ch)
        acc_ref[:, 0:1, :, :] = (acc_ref[:, 0:1, :, :]
                                 + tc * w[0, 1] + tl * w[0, 0] + tr * w[0, 2])

    @pl.when(r < n_r - 1)
    def _add_bot_halo():
        bc = bot_ref[...].astype(jnp.float32)
        bl, br = _w_neighbors(bc, g, ch)
        acc_ref[:, TH - 1:TH, :, :] = (acc_ref[:, TH - 1:TH, :, :]
                                       + bc * w[2, 1] + bl * w[2, 0] + br * w[2, 2])

    # TODO(synk): in full PVTv2, fuse the GELU that follows DWConv here to save a full
    # HBM round trip of the activation (out of scope for this standalone module).
    o_ref[...] = acc_ref[...].astype(o_ref.dtype)


def _pick_row_tile(H, row_bytes, budget=1 << 20):
    """Row-tile height targeting ~1 MiB main input blocks (true itemsize).

    Prefers a divisor of H (no padding); if the best divisor is degenerate
    (e.g. prime H), returns a ragged tile and a padded H instead.
    """
    target = max(1, min(H, budget // max(row_bytes, 1)))
    best = 1
    for d in range(1, target + 1):
        if H % d == 0:
            best = d
    if 2 * best >= target:
        return best, H
    padded = ((H + target - 1) // target) * target
    return target, padded


def dwconv_forward(x, weight, bias, H, W, *, row_tile=None):
    """DWConv forward. x: (B, N, C) with N == H*W; weight: (3, 3, C); bias: (C,)."""
    B, N, C = x.shape
    assert N == H * W, "N must equal H*W"
    assert weight.shape == (3, 3, C), "weight must be (3, 3, C)"
    assert bias.shape == (C,), "bias must be (C,)"
    dtype = x.dtype

    x_nhwc = x.reshape(B, H, W, C)

    # Lane blocking: present a lane-dense last dim to the kernel whenever possible.
    if C % 128 == 0:
        g, Wf, lane, n_cb = 1, W, 128, C // 128
        x_k, w_k, b_k = x_nhwc, weight, bias
    elif 128 % C == 0 and W % (128 // C) == 0:
        # Small-C path: fold g = 128 // C adjacent columns into the lane dim (pure reshape).
        g = 128 // C
        Wf, lane, n_cb = W // g, 128, 1
        x_k = x_nhwc.reshape(B, H, Wf, lane)
        w_k = jnp.tile(weight, (1, 1, g))
        b_k = jnp.tile(bias, (g,))
    else:
        # Fallback: full-C lanes (partially masked stores for awkward C).
        g, Wf, lane, n_cb = 1, W, C, 1
        x_k, w_k, b_k = x_nhwc, weight, bias

    w_k = w_k.astype(jnp.float32)
    b_k = b_k.astype(jnp.float32).reshape(1, -1)
    Ltot = n_cb * lane

    row_bytes = Wf * lane * dtype.itemsize
    if row_tile is not None:
        TH = int(row_tile)
        Hp = ((H + TH - 1) // TH) * TH
    else:
        TH, Hp = _pick_row_tile(H, row_bytes)
    if Hp != H:
        # Zero rows below the image reproduce the conv's zero padding; the extra
        # output rows are sliced off after the call.
        x_k = jnp.pad(x_k, ((0, 0), (0, Hp - H), (0, 0), (0, 0)))
    n_rt = Hp // TH

    # Row-tile axis innermost so the weight/bias blocks are reused across it; all axes
    # parallel so the compiler can shard across TensorCores (megacore / v7x dual-TC).
    grid = (B, n_cb, n_rt)

    x_spec = pl.BlockSpec((1, TH, Wf, lane), lambda bb, cc, rr: (bb, rr, 0, cc))
    # 1-row halo blocks: block size 1 in H, so the index map returns an absolute row,
    # clamped into range; the kernel skips the contribution at the image borders.
    top_spec = pl.BlockSpec(
        (1, 1, Wf, lane), lambda bb, cc, rr: (bb, jnp.maximum(rr * TH - 1, 0), 0, cc))
    bot_spec = pl.BlockSpec(
        (1, 1, Wf, lane), lambda bb, cc, rr: (bb, jnp.minimum(rr * TH + TH, Hp - 1), 0, cc))
    w_spec = pl.BlockSpec((3, 3, lane), lambda bb, cc, rr: (0, 0, cc))
    b_spec = pl.BlockSpec((1, lane), lambda bb, cc, rr: (0, cc))
    o_spec = pl.BlockSpec((1, TH, Wf, lane), lambda bb, cc, rr: (bb, rr, 0, cc))

    out = pl.pallas_call(
        partial(_dwconv_kernel, g=g, ch=C if g > 1 else lane),
        out_shape=jax.ShapeDtypeStruct((B, Hp, Wf, Ltot), dtype),
        grid_spec=pltpu.PrefetchScalarGridSpec(
            num_scalar_prefetch=0,
            grid=grid,
            in_specs=[x_spec, top_spec, bot_spec, w_spec, b_spec],
            out_specs=o_spec,
            scratch_shapes=[pltpu.VMEM((1, TH, Wf, lane), jnp.float32)],
        ),
        compiler_params=pltpu.CompilerParams(
            dimension_semantics=("parallel", "parallel", "parallel"),
            vmem_limit_bytes=32 * 1024 * 1024,
        ),
    )(x_k, x_k, x_k, w_k, b_k)

    if Hp != H:
        out = out[:, :H]
    return out.reshape(B, N, C)


def _reference_dwconv(x, weight, bias, H, W):
    """Pure-JAX reference (NCHW depthwise conv, like torch)."""
    B, N, C = x.shape
    x_nchw = jnp.transpose(x, (0, 2, 1)).reshape(B, C, H, W)
    w_oihw = jnp.transpose(weight, (2, 0, 1))[:, None, :, :]   # (C, 1, 3, 3)
    y = jax.lax.conv_general_dilated(
        x_nchw, w_oihw, window_strides=(1, 1), padding=((1, 1), (1, 1)),
        dimension_numbers=("NCHW", "OIHW", "NCHW"), feature_group_count=C)
    y = y + bias[None, :, None, None]
    return jnp.transpose(y.reshape(B, C, N), (0, 2, 1))


if __name__ == "__main__":
    root_key = jax.random.PRNGKey(0)

    def run_case(case_id, B, C, H, W, row_tile=None, dtype=jnp.float32, tol=2e-5):
        kx, kw, kb = jax.random.split(jax.random.fold_in(root_key, case_id), 3)
        N = H * W
        x = jax.random.normal(kx, (B, N, C), dtype=jnp.float32).astype(dtype)
        weight = (jax.random.normal(kw, (3, 3, C), dtype=jnp.float32) * 0.1).astype(dtype)
        bias = (jax.random.normal(kb, (C,), dtype=jnp.float32) * 0.1).astype(dtype)

        y = dwconv_forward(x, weight, bias, H, W, row_tile=row_tile)
        jax.block_until_ready(y)

        y_ref = _reference_dwconv(x.astype(jnp.float32), weight.astype(jnp.float32),
                                  bias.astype(jnp.float32), H, W)
        assert y.shape == (B, N, C)
        assert jnp.allclose(y.astype(jnp.float32), y_ref, atol=tol, rtol=tol), (
            f"mismatch vs reference (B={B}, C={C}, H={H}, W={W}, "
            f"row_tile={row_tile}, dtype={dtype})")

    # 1) Lane-dense path: 2 channel blocks of 128 lanes, 2 row tiles (halo fixups
    #    across the tile boundary), XLU-roll W shifts.
    run_case(1, B=2, C=256, H=16, W=16, row_tile=8)
    # 2) Small-C folded path (PVTv2-style C=32): 4 columns folded into 128 lanes,
    #    3 row tiles exercising the lane-roll + column-group wrap fixup.
    run_case(2, B=2, C=32, H=12, W=32, row_tile=4)
    # 3) Fallback path (C neither multiple nor divisor of 128) + non-divisor H
    #    (padded rows) + unaligned-W concatenate fallback for the column shift.
    run_case(3, B=1, C=48, H=10, W=6, row_tile=4)
    # 4) bf16 numerics: products/accumulation in f32, output cast back to bf16.
    run_case(4, B=1, C=128, H=8, W=16, dtype=jnp.bfloat16, tol=5e-2)

    print("KERNEL_OK")
</pallas_src>

<mosaic_0001>
module attributes {stable_mosaic.version = 11 : i64} {
  func.func @_dwconv_kernel(%arg0: i32, %arg1: i32, %arg2: i32, %arg3: memref<1x8x16x128xf32, #tpu.memory_space<vmem>>, %arg4: memref<1x1x16x128xf32, #tpu.memory_space<vmem>>, %arg5: memref<1x1x16x128xf32, #tpu.memory_space<vmem>>, %arg6: memref<3x3x128xf32, #tpu.memory_space<vmem>>, %arg7: memref<1x128xf32, #tpu.memory_space<vmem>>, %arg8: memref<1x8x16x128xf32, #tpu.memory_space<vmem>>, %arg9: memref<1x8x16x128xf32, #tpu.memory_space<vmem>>) attributes {dimension_semantics = [#tpu.dimension_semantics<parallel>, #tpu.dimension_semantics<parallel>, #tpu.dimension_semantics<parallel>], iteration_bounds = array<i64: 2, 2, 2>, scalar_prefetch = 0 : i64, scratch_operands = 1 : i64, tpu.core_type = #tpu.core_type<tc>, window_params = [{transform_indices = @transform_0, window_bounds = array<i64: 1, 8, 16, 128>}, {transform_indices = @transform_1, window_bounds = array<i64: 1, 1, 16, 128>}, {transform_indices = @transform_2, window_bounds = array<i64: 1, 1, 16, 128>}, {transform_indices = @transform_3, window_bounds = array<i64: 3, 3, 128>}, {transform_indices = @transform_4, window_bounds = array<i64: 1, 128>}, {transform_indices = @transform_5, window_bounds = array<i64: 1, 8, 16, 128>}]} {
    %c0 = arith.constant 0 : index
    %c0_0 = arith.constant 0 : index
    %c0_1 = arith.constant 0 : index
    %0 = vector.load %arg6[%c0, %c0_0, %c0_1] : memref<3x3x128xf32, #tpu.memory_space<vmem>>, vector<3x3x128xf32>
    %c0_2 = arith.constant 0 : index
    %c0_3 = arith.constant 0 : index
    %1 = vector.load %arg7[%c0_2, %c0_3] : memref<1x128xf32, #tpu.memory_space<vmem>>, vector<1x128xf32>
    %c0_4 = arith.constant 0 : index
    %c0_5 = arith.constant 0 : index
    %c0_6 = arith.constant 0 : index
    %c0_7 = arith.constant 0 : index
    %2 = vector.load %arg3[%c0_4, %c0_5, %c0_6, %c0_7] : memref<1x8x16x128xf32, #tpu.memory_space<vmem>>, vector<1x8x16x128xf32>
    %c1_i32 = arith.constant 1 : i32
    %3 = tpu.dynamic_rotate %2 by %c1_i32 dim 2 : vector<1x8x16x128xf32>, i32 -> vector<1x8x16x128xf32>
    %4 = tpu.iota {dimensions = array<i32: 2>} : vector<1x8x16x128xi32>
    %c0_i32 = arith.constant 0 : i32
    %5 = vector.broadcast %c0_i32 : i32 to vector<1x8x16x128xi32>
    %6 = arith.cmpi eq, %4, %5 : vector<1x8x16x128xi32>
    %cst = arith.constant 0.000000e+00 : f32
    %7 = vector.broadcast %cst : f32 to vector<1x8x16x128xf32>
    %8 = arith.select %6, %7, %3 : vector<1x8x16x128xi1>, vector<1x8x16x128xf32>
    %c15_i32 = arith.constant 15 : i32
    %9 = tpu.dynamic_rotate %2 by %c15_i32 dim 2 : vector<1x8x16x128xf32>, i32 -> vector<1x8x16x128xf32>
    %10 = tpu.iota {dimensions = array<i32: 2>} : vector<1x8x16x128xi32>
    %c15_i32_8 = arith.constant 15 : i32
    %11 = vector.broadcast %c15_i32_8 : i32 to vector<1x8x16x128xi32>
    %12 = arith.cmpi eq, %10, %11 : vector<1x8x16x128xi32>
    %cst_9 = arith.constant 0.000000e+00 : f32
    %13 = vector.broadcast %cst_9 : f32 to vector<1x8x16x128xf32>
    %14 = arith.select %12, %13, %9 : vector<1x8x16x128xi1>, vector<1x8x16x128xf32>
    %15 = vector.extract_strided_slice %0 {offsets = [1, 1, 0], sizes = [1, 1, 128], strides = [1, 1, 1]} : vector<3x3x128xf32> to vector<1x1x128xf32>
    %16 = vector.shape_cast %15 : vector<1x1x128xf32> to vector<128xf32>
    %17 = vector.shape_cast %16 : vector<128xf32> to vector<1x1x1x128xf32>
    %18 = vector.broadcast %17 : vector<1x1x1x128xf32> to vector<1x8x16x128xf32>
    %19 = arith.mulf %2, %18 : vector<1x8x16x128xf32>
    %20 = vector.extract_strided_slice %0 {offsets = [1, 0, 0], sizes = [1, 1, 128], strides = [1, 1, 1]} : vector<3x3x128xf32> to vector<1x1x128xf32>
    %21 = vector.shape_cast %20 : vector<1x1x128xf32> to vector<128xf32>
    %22 = vector.shape_cast %21 : vector<128xf32> to vector<1x1x1x128xf32>
    %23 = vector.broadcast %22 : vector<1x1x1x128xf32> to vector<1x8x16x128xf32>
    %24 = arith.mulf %8, %23 : vector<1x8x16x128xf32>
    %25 = arith.addf %19, %24 : vector<1x8x16x128xf32>
    %26 = vector.extract_strided_slice %0 {offsets = [1, 2, 0], sizes = [1, 1, 128], strides = [1, 1, 1]} : vector<3x3x128xf32> to vector<1x1x128xf32>
    %27 = vector.shape_cast %26 : vector<1x1x128xf32> to vector<128xf32>
    %28 = vector.shape_cast %27 : vector<128xf32> to vector<1x1x1x128xf32>
    %29 = vector.broadcast %28 : vector<1x1x1x128xf32> to vector<1x8x16x128xf32>
    %30 = arith.mulf %14, %29 : vector<1x8x16x128xf32>
    %31 = arith.addf %25, %30 : vector<1x8x16x128xf32>
    %32 = vector.shape_cast %1 : vector<1x128xf32> to vector<1x1x1x128xf32>
    %33 = vector.broadcast %32 : vector<1x1x1x128xf32> to vector<1x8x16x128xf32>
    %34 = arith.addf %31, %33 : vector<1x8x16x128xf32>
    %c0_10 = arith.constant 0 : index
    %c0_11 = arith.constant 0 : index
    %c0_12 = arith.constant 0 : index
    %c0_13 = arith.constant 0 : index
    %35 = vector.load %arg9[%c0_10, %c0_11, %c0_12, %c0_13] : memref<1x8x16x128xf32, #tpu.memory_space<vmem>>, vector<1x8x16x128xf32>
    tpu.vector_store %arg9[%c0_10, %c0_11, %c0_12, %c0_13], %34 {strides = array<i32>} : memref<1x8x16x128xf32, #tpu.memory_space<vmem>>, vector<1x8x16x128xf32>,
    %c0_14 = arith.constant 0 : index
    %c1 = arith.constant 1 : index
    %c0_15 = arith.constant 0 : index
    %c0_16 = arith.constant 0 : index
    %36 = vector.load %arg9[%c0_14, %c1, %c0_15, %c0_16] : memref<1x8x16x128xf32, #tpu.memory_space<vmem>>, vector<1x7x16x128xf32>
    %37 = vector.extract_strided_slice %2 {offsets = [0, 0, 0, 0], sizes = [1, 7, 16, 128], strides = [1, 1, 1, 1]} : vector<1x8x16x128xf32> to vector<1x7x16x128xf32>
    %38 = vector.extract_strided_slice %0 {offsets = [0, 1, 0], sizes = [1, 1, 128], strides = [1, 1, 1]} : vector<3x3x128xf32> to vector<1x1x128xf32>
    %39 = vector.shape_cast %38 : vector<1x1x128xf32> to vector<128xf32>
    %40 = vector.shape_cast %39 : vector<128xf32> to vector<1x1x1x128xf32>
    %41 = vector.broadcast %40 : vector<1x1x1x128xf32> to vector<1x7x16x128xf32>
    %42 = arith.mulf %37, %41 : vector<1x7x16x128xf32>
    %43 = arith.addf %36, %42 : vector<1x7x16x128xf32>
    %44 = vector.extract_strided_slice %8 {offsets = [0, 0, 0, 0], sizes = [1, 7, 16, 128], strides = [1, 1, 1, 1]} : vector<1x8x16x128xf32> to vector<1x7x16x128xf32>
    %45 = vector.extract_strided_slice %0 {offsets = [0, 0, 0], sizes = [1, 1, 128], strides = [1, 1, 1]} : vector<3x3x128xf32> to vector<1x1x128xf32>
    %46 = vector.shape_cast %45 : vector<1x1x128xf32> to vector<128xf32>
    %47 = vector.shape_cast %46 : vector<128xf32> to vector<1x1x1x128xf32>
    %48 = vector.broadcast %47 : vector<1x1x1x128xf32> to vector<1x7x16x128xf32>
    %49 = arith.mulf %44, %48 : vector<1x7x16x128xf32>
    %50 = arith.addf %43, %49 : vector<1x7x16x128xf32>
    %51 = vector.extract_strided_slice %14 {offsets = [0, 0, 0, 0], sizes = [1, 7, 16, 128], strides = [1, 1, 1, 1]} : vector<1x8x16x128xf32> to vector<1x7x16x128xf32>
    %52 = vector.extract_strided_slice %0 {offsets = [0, 2, 0], sizes = [1, 1, 128], strides = [1, 1, 1]} : vector<3x3x128xf32> to vector<1x1x128xf32>
    %53 = vector.shape_cast %52 : vector<1x1x128xf32> to vector<128xf32>
    %54 = vector.shape_cast %53 : vector<128xf32> to vector<1x1x1x128xf32>
    %55 = vector.broadcast %54 : vector<1x1x1x128xf32> to vector<1x7x16x128xf32>
    %56 = arith.mulf %51, %55 : vector<1x7x16x128xf32>
    %57 = arith.addf %50, %56 : vector<1x7x16x128xf32>
    %c0_17 = arith.constant 0 : index
    %c1_18 = arith.constant 1 : index
    %c0_19 = arith.constant 0 : index
    %c0_20 = arith.constant 0 : index
    %58 = vector.load %arg9[%c0_17, %c1_18, %c0_19, %c0_20] : memref<1x8x16x128xf32, #tpu.memory_space<vmem>>, vector<1x7x16x128xf32>
    tpu.vector_store %arg9[%c0_17, %c1_18, %c0_19, %c0_20], %57 {strides = array<i32>} : memref<1x8x16x128xf32, #tpu.memory_space<vmem>>, vector<1x7x16x128xf32>,
    %c0_21 = arith.constant 0 : index
    %c0_22 = arith.constant 0 : index
    %c0_23 = arith.constant 0 : index
    %c0_24 = arith.constant 0 : index
    %59 = vector.load %arg9[%c0_21, %c0_22, %c0_23, %c0_24] : memref<1x8x16x128xf32, #tpu.memory_space<vmem>>, vector<1x7x16x128xf32>
    %60 = vector.extract_strided_slice %2 {offsets = [0, 1, 0, 0], sizes = [1, 7, 16, 128], strides = [1, 1, 1, 1]} : vector<1x8x16x128xf32> to vector<1x7x16x128xf32>
    %61 = vector.extract_strided_slice %0 {offsets = [2, 1, 0], sizes = [1, 1, 128], strides = [1, 1, 1]} : vector<3x3x128xf32> to vector<1x1x128xf32>
    %62 = vector.shape_cast %61 : vector<1x1x128xf32> to vector<128xf32>
    %63 = vector.shape_cast %62 : vector<128xf32> to vector<1x1x1x128xf32>
    %64 = vector.broadcast %63 : vector<1x1x1x128xf32> to vector<1x7x16x128xf32>
    %65 = arith.mulf %60, %64 : vector<1x7x16x128xf32>
    %66 = arith.addf %59, %65 : vector<1x7x16x128xf32>
    %67 = vector.extract_strided_slice %8 {offsets = [0, 1, 0, 0], sizes = [1, 7, 16, 128], strides = [1, 1, 1, 1]} : vector<1x8x16x128xf32> to vector<1x7x16x128xf32>
    %68 = vector.extract_strided_slice %0 {offsets = [2, 0, 0], sizes = [1, 1, 128], strides = [1, 1, 1]} : vector<3x3x128xf32> to vector<1x1x128xf32>
    %69 = vector.shape_cast %68 : vector<1x1x128xf32> to vector<128xf32>
    %70 = vector.shape_cast %69 : vector<128xf32> to vector<1x1x1x128xf32>
    %71 = vector.broadcast %70 : vector<1x1x1x128xf32> to vector<1x7x16x128xf32>
    %72 = arith.mulf %67, %71 : vector<1x7x16x128xf32>
    %73 = arith.addf %66, %72 : vector<1x7x16x128xf32>
    %74 = vector.extract_strided_slice %14 {offsets = [0, 1, 0, 0], sizes = [1, 7, 16, 128], strides = [1, 1, 1, 1]} : vector<1x8x16x128xf32> to vector<1x7x16x128xf32>
    %75 = vector.extract_strided_slice %0 {offsets = [2, 2, 0], sizes = [1, 1, 128], strides = [1, 1, 1]} : vector<3x3x128xf32> to vector<1x1x128xf32>
    %76 = vector.shape_cast %75 : vector<1x1x128xf32> to vector<128xf32>
    %77 = vector.shape_cast %76 : vector<128xf32> to vector<1x1x1x128xf32>
    %78 = vector.broadcast %77 : vector<1x1x1x128xf32> to vector<1x7x16x128xf32>
    %79 = arith.mulf %74, %78 : vector<1x7x16x128xf32>
    %80 = arith.addf %73, %79 : vector<1x7x16x128xf32>
    %c0_25 = arith.constant 0 : index
    %c0_26 = arith.constant 0 : index
    %c0_27 = arith.constant 0 : index
    %c0_28 = arith.constant 0 : index
    %81 = vector.load %arg9[%c0_25, %c0_26, %c0_27, %c0_28] : memref<1x8x16x128xf32, #tpu.memory_space<vmem>>, vector<1x7x16x128xf32>
    tpu.vector_store %arg9[%c0_25, %c0_26, %c0_27, %c0_28], %80 {strides = array<i32>} : memref<1x8x16x128xf32, #tpu.memory_space<vmem>>, vector<1x7x16x128xf32>,
    %c0_i32_29 = arith.constant 0 : i32
    %82 = arith.cmpi sgt, %arg2, %c0_i32_29 : i32
    %83 = arith.extui %82 : i1 to i32
    %c0_i32_30 = arith.constant 0 : i32
    %84 = arith.cmpi ne, %83, %c0_i32_30 : i32
    scf.if %84 {
      %c0_41 = arith.constant 0 : index
      %c0_42 = arith.constant 0 : index
      %c0_43 = arith.constant 0 : index
      %c0_44 = arith.constant 0 : index
      %90 = vector.load %arg4[%c0_41, %c0_42, %c0_43, %c0_44] : memref<1x1x16x128xf32, #tpu.memory_space<vmem>>, vector<1x1x16x128xf32>
      %c1_i32_45 = arith.constant 1 : i32
      %91 = tpu.dynamic_rotate %90 by %c1_i32_45 dim 2 : vector<1x1x16x128xf32>, i32 -> vector<1x1x16x128xf32>
      %92 = tpu.iota {dimensions = array<i32: 2>} : vector<1x1x16x128xi32>
      %c0_i32_46 = arith.constant 0 : i32
      %93 = vector.broadcast %c0_i32_46 : i32 to vector<1x1x16x128xi32>
      %94 = arith.cmpi eq, %92, %93 : vector<1x1x16x128xi32>
      %cst_47 = arith.constant 0.000000e+00 : f32
      %95 = vector.broadcast %cst_47 : f32 to vector<1x1x16x128xf32>
      %96 = arith.select %94, %95, %91 : vector<1x1x16x128xi1>, vector<1x1x16x128xf32>
      %c15_i32_48 = arith.constant 15 : i32
      %97 = tpu.dynamic_rotate %90 by %c15_i32_48 dim 2 : vector<1x1x16x128xf32>, i32 -> vector<1x1x16x128xf32>
      %98 = tpu.iota {dimensions = array<i32: 2>} : vector<1x1x16x128xi32>
      %c15_i32_49 = arith.constant 15 : i32
      %99 = vector.broadcast %c15_i32_49 : i32 to vector<1x1x16x128xi32>
      %100 = arith.cmpi eq, %98, %99 : vector<1x1x16x128xi32>
      %cst_50 = arith.constant 0.000000e+00 : f32
      %101 = vector.broadcast %cst_50 : f32 to vector<1x1x16x128xf32>
      %102 = arith.select %100, %101, %97 : vector<1x1x16x128xi1>, vector<1x1x16x128xf32>
      %c0_51 = arith.constant 0 : index
      %c0_52 = arith.constant 0 : index
      %c0_53 = arith.constant 0 : index
      %c0_54 = arith.constant 0 : index
      %103 = vector.load %arg9[%c0_51, %c0_52, %c0_53, %c0_54] : memref<1x8x16x128xf32, #tpu.memory_space<vmem>>, vector<1x1x16x128xf32>
      %104 = vector.extract_strided_slice %0 {offsets = [0, 1, 0], sizes = [1, 1, 128], strides = [1, 1, 1]} : vector<3x3x128xf32> to vector<1x1x128xf32>
      %105 = vector.shape_cast %104 : vector<1x1x128xf32> to vector<128xf32>
      %106 = vector.shape_cast %105 : vector<128xf32> to vector<1x1x1x128xf32>
      %107 = vector.broadcast %106 : vector<1x1x1x128xf32> to vector<1x1x16x128xf32>
      %108 = arith.mulf %90, %107 : vector<1x1x16x128xf32>
      %109 = arith.addf %103, %108 : vector<1x1x16x128xf32>
      %110 = vector.extract_strided_slice %0 {offsets = [0, 0, 0], sizes = [1, 1, 128], strides = [1, 1, 1]} : vector<3x3x128xf32> to vector<1x1x128xf32>
      %111 = vector.shape_cast %110 : vector<1x1x128xf32> to vector<128xf32>
      %112 = vector.shape_cast %111 : vector<128xf32> to vector<1x1x1x128xf32>
      %113 = vector.broadcast %112 : vector<1x1x1x128xf32> to vector<1x1x16x128xf32>
      %114 = arith.mulf %96, %113 : vector<1x1x16x128xf32>
      %115 = arith.addf %109, %114 : vector<1x1x16x128xf32>
      %116 = vector.extract_strided_slice %0 {offsets = [0, 2, 0], sizes = [1, 1, 128], strides = [1, 1, 1]} : vector<3x3x128xf32> to vector<1x1x128xf32>
      %117 = vector.shape_cast %116 : vector<1x1x128xf32> to vector<128xf32>
      %118 = vector.shape_cast %117 : vector<128xf32> to vector<1x1x1x128xf32>
      %119 = vector.broadcast %118 : vector<1x1x1x128xf32> to vector<1x1x16x128xf32>
      %120 = arith.mulf %102, %119 : vector<1x1x16x128xf32>
      %121 = arith.addf %115, %120 : vector<1x1x16x128xf32>
      %c0_55 = arith.constant 0 : index
      %c0_56 = arith.constant 0 : index
      %c0_57 = arith.constant 0 : index
      %c0_58 = arith.constant 0 : index
      %122 = vector.load %arg9[%c0_55, %c0_56, %c0_57, %c0_58] : memref<1x8x16x128xf32, #tpu.memory_space<vmem>>, vector<1x1x16x128xf32>
      tpu.vector_store %arg9[%c0_55, %c0_56, %c0_57, %c0_58], %121 {strides = array<i32>} : memref<1x8x16x128xf32, #tpu.memory_space<vmem>>, vector<1x1x16x128xf32>,
    } else {
    }
    %c1_i32_31 = arith.constant 1 : i32
    %85 = arith.cmpi slt, %arg2, %c1_i32_31 : i32
    %86 = arith.extui %85 : i1 to i32
    %c0_i32_32 = arith.constant 0 : i32
    %87 = arith.cmpi ne, %86, %c0_i32_32 : i32
    scf.if %87 {
      %c0_41 = arith.constant 0 : index
      %c0_42 = arith.constant 0 : index
      %c0_43 = arith.constant 0 : index
      %c0_44 = arith.constant 0 : index
      %90 = vector.load %arg5[%c0_41, %c0_42, %c0_43, %c0_44] : memref<1x1x16x128xf32, #tpu.memory_space<vmem>>, vector<1x1x16x128xf32>
      %c1_i32_45 = arith.constant 1 : i32
      %91 = tpu.dynamic_rotate %90 by %c1_i32_45 dim 2 : vector<1x1x16x128xf32>, i32 -> vector<1x1x16x128xf32>
      %92 = tpu.iota {dimensions = array<i32: 2>} : vector<1x1x16x128xi32>
      %c0_i32_46 = arith.constant 0 : i32
      %93 = vector.broadcast %c0_i32_46 : i32 to vector<1x1x16x128xi32>
      %94 = arith.cmpi eq, %92, %93 : vector<1x1x16x128xi32>
      %cst_47 = arith.constant 0.000000e+00 : f32
      %95 = vector.broadcast %cst_47 : f32 to vector<1x1x16x128xf32>
      %96 = arith.select %94, %95, %91 : vector<1x1x16x128xi1>, vector<1x1x16x128xf32>
      %c15_i32_48 = arith.constant 15 : i32
      %97 = tpu.dynamic_rotate %90 by %c15_i32_48 dim 2 : vector<1x1x16x128xf32>, i32 -> vector<1x1x16x128xf32>
      %98 = tpu.iota {dimensions = array<i32: 2>} : vector<1x1x16x128xi32>
      %c15_i32_49 = arith.constant 15 : i32
      %99 = vector.broadcast %c15_i32_49 : i32 to vector<1x1x16x128xi32>
      %100 = arith.cmpi eq, %98, %99 : vector<1x1x16x128xi32>
      %cst_50 = arith.constant 0.000000e+00 : f32
      %101 = vector.broadcast %cst_50 : f32 to vector<1x1x16x128xf32>
      %102 = arith.select %100, %101, %97 : vector<1x1x16x128xi1>, vector<1x1x16x128xf32>
      %c0_51 = arith.constant 0 : index
      %c7 = arith.constant 7 : index
      %c0_52 = arith.constant 0 : index
      %c0_53 = arith.constant 0 : index
      %103 = vector.load %arg9[%c0_51, %c7, %c0_52, %c0_53] : memref<1x8x16x128xf32, #tpu.memory_space<vmem>>, vector<1x1x16x128xf32>
      %104 = vector.extract_strided_slice %0 {offsets = [2, 1, 0], sizes = [1, 1, 128], strides = [1, 1, 1]} : vector<3x3x128xf32> to vector<1x1x128xf32>
      %105 = vector.shape_cast %104 : vector<1x1x128xf32> to vector<128xf32>
      %106 = vector.shape_cast %105 : vector<128xf32> to vector<1x1x1x128xf32>
      %107 = vector.broadcast %106 : vector<1x1x1x128xf32> to vector<1x1x16x128xf32>
      %108 = arith.mulf %90, %107 : vector<1x1x16x128xf32>
      %109 = arith.addf %103, %108 : vector<1x1x16x128xf32>
      %110 = vector.extract_strided_slice %0 {offsets = [2, 0, 0], sizes = [1, 1, 128], strides = [1, 1, 1]} : vector<3x3x128xf32> to vector<1x1x128xf32>
      %111 = vector.shape_cast %110 : vector<1x1x128xf32> to vector<128xf32>
      %112 = vector.shape_cast %111 : vector<128xf32> to vector<1x1x1x128xf32>
      %113 = vector.broadcast %112 : vector<1x1x1x128xf32> to vector<1x1x16x128xf32>
      %114 = arith.mulf %96, %113 : vector<1x1x16x128xf32>
      %115 = arith.addf %109, %114 : vector<1x1x16x128xf32>
      %116 = vector.extract_strided_slice %0 {offsets = [2, 2, 0], sizes = [1, 1, 128], strides = [1, 1, 1]} : vector<3x3x128xf32> to vector<1x1x128xf32>
      %117 = vector.shape_cast %116 : vector<1x1x128xf32> to vector<128xf32>
      %118 = vector.shape_cast %117 : vector<128xf32> to vector<1x1x1x128xf32>
      %119 = vector.broadcast %118 : vector<1x1x1x128xf32> to vector<1x1x16x128xf32>
      %120 = arith.mulf %102, %119 : vector<1x1x16x128xf32>
      %121 = arith.addf %115, %120 : vector<1x1x16x128xf32>
      %c0_54 = arith.constant 0 : index
      %c7_55 = arith.constant 7 : index
      %c0_56 = arith.constant 0 : index
      %c0_57 = arith.constant 0 : index
      %122 = vector.load %arg9[%c0_54, %c7_55, %c0_56, %c0_57] : memref<1x8x16x128xf32, #tpu.memory_space<vmem>>, vector<1x1x16x128xf32>
      tpu.vector_store %arg9[%c0_54, %c7_55, %c0_56, %c0_57], %121 {strides = array<i32>} : memref<1x8x16x128xf32, #tpu.memory_space<vmem>>, vector<1x1x16x128xf32>,
    } else {
    }
    %c0_33 = arith.constant 0 : index
    %c0_34 = arith.constant 0 : index
    %c0_35 = arith.constant 0 : index
    %c0_36 = arith.constant 0 : index
    %88 = vector.load %arg9[%c0_33, %c0_34, %c0_35, %c0_36] : memref<1x8x16x128xf32, #tpu.memory_space<vmem>>, vector<1x8x16x128xf32>
    %c0_37 = arith.constant 0 : index
    %c0_38 = arith.constant 0 : index
    %c0_39 = arith.constant 0 : index
    %c0_40 = arith.constant 0 : index
    %89 = vector.load %arg8[%c0_37, %c0_38, %c0_39, %c0_40] : memref<1x8x16x128xf32, #tpu.memory_space<vmem>>, vector<1x8x16x128xf32>
    tpu.vector_store %arg8[%c0_37, %c0_38, %c0_39, %c0_40], %88 {strides = array<i32>} : memref<1x8x16x128xf32, #tpu.memory_space<vmem>>, vector<1x8x16x128xf32>,
    return
  }
  func.func @transform_0(%arg0: i32, %arg1: i32, %arg2: i32) -> (i32, i32, i32, i32) {
    %c0_i32 = arith.constant 0 : i32
    %c0_i32_0 = arith.constant 0 : i32
    return %arg0, %arg2, %c0_i32, %arg1 : i32, i32, i32, i32
  }
  func.func @transform_1(%arg0: i32, %arg1: i32, %arg2: i32) -> (i32, i32, i32, i32) {
    %c8_i32 = arith.constant 8 : i32
    %0 = arith.muli %arg2, %c8_i32 : i32
    %c1_i32 = arith.constant 1 : i32
    %1 = arith.subi %0, %c1_i32 : i32
    %c0_i32 = arith.constant 0 : i32
    %2 = arith.maxsi %1, %c0_i32 : i32
    %c0_i32_0 = arith.constant 0 : i32
    %c0_i32_1 = arith.constant 0 : i32
    return %arg0, %2, %c0_i32_0, %arg1 : i32, i32, i32, i32
  }
  func.func @transform_2(%arg0: i32, %arg1: i32, %arg2: i32) -> (i32, i32, i32, i32) {
    %c8_i32 = arith.constant 8 : i32
    %0 = arith.muli %arg2, %c8_i32 : i32
    %c8_i32_0 = arith.constant 8 : i32
    %1 = arith.addi %0, %c8_i32_0 : i32
    %c15_i32 = arith.constant 15 : i32
    %2 = arith.minsi %1, %c15_i32 : i32
    %c0_i32 = arith.constant 0 : i32
    %c0_i32_1 = arith.constant 0 : i32
    return %arg0, %2, %c0_i32, %arg1 : i32, i32, i32, i32
  }
  func.func @transform_3(%arg0: i32, %arg1: i32, %arg2: i32) -> (i32, i32, i32) {
    %c0_i32 = arith.constant 0 : i32
    %c0_i32_0 = arith.constant 0 : i32
    %c0_i32_1 = arith.constant 0 : i32
    return %c0_i32, %c0_i32_0, %arg1 : i32, i32, i32
  }
  func.func @transform_4(%arg0: i32, %arg1: i32, %arg2: i32) -> (i32, i32) {
    %c0_i32 = arith.constant 0 : i32
    %c0_i32_0 = arith.constant 0 : i32
    return %c0_i32, %arg1 : i32, i32
  }
  func.func @transform_5(%arg0: i32, %arg1: i32, %arg2: i32) -> (i32, i32, i32, i32) {
    %c0_i32 = arith.constant 0 : i32
    %c0_i32_0 = arith.constant 0 : i32
    return %arg0, %arg2, %c0_i32, %arg1 : i32, i32, i32, i32
  }
}

</mosaic_0001>

<bundles_post_ra>
// kernel: tpu_custom_call.1
= control target key start
LH: loop header
LB: loop body
LE: loop exit
PB: predicated region body
PF: predicated region fallthrough
CT: control target
= control target key end

     0   :  { %s3129_s0 = inlined_call_operand.hbm [shape: f32[2,16,16,256], index: 0, kind: input, shape index: {}]   ;;  %s3130_s1 = inlined_call_operand.hbm [shape: f32[2,16,16,256], index: 1, kind: input, shape index: {}]   ;;  %s3131_s2 = inlined_call_operand.hbm [shape: f32[2,16,16,256], index: 2, kind: input, shape index: {}]   ;;  %s3132_s3 = inlined_call_operand.hbm [shape: f32[3,3,256], index: 3, kind: input, shape index: {}]   ;;  %s3133_s4 = inlined_call_operand.vmem [shape: f32[1,256], index: 4, kind: input, shape index: {}]   ;;  %s3134_s5 = inlined_call_operand.hbm [shape: f32[2,16,16,256], index: 5, kind: output, shape index: {}]  }
   0x1   :  { %3223 = sst [smem:[#allocation71_spill]] %s3129_s0 }
   0x2   :  { %3224 = sst [smem:[#allocation72_spill]] %s3130_s1 }
   0x3   :  { %3225 = sst [smem:[#allocation73_spill]] %s3131_s2 }
   0x4   :  { %3226 = sst [smem:[#allocation74_spill]] %s3132_s3 }
   0x5   :  { %3227 = sst [smem:[#allocation75_spill]] %s3133_s4 }
   0x6   :  { %3228 = sst [smem:[#allocation76_spill]] %s3134_s5 }
   0x7   :  { %10 = vsyncpa [#allocation4], 0 }
   0x8   :  { %12 = vsyncpa [#allocation4 + $0x1], 0 }
   0x9   :  { %13 = vsyncpa [#allocation7], 0 }
   0xa   :  { %15 = vsyncpa [#allocation7 + $0x1], 0 }
   0xb   :  { %16 = vsyncpa [#allocation10], 0 }
   0xc   :  { %18 = vsyncpa [#allocation10 + $0x1], 0 }
   0xd   :  { %19 = vsyncpa [#allocation5], 0 }
   0xe   :  { %21 = vsyncpa [#allocation5 + $0x1], 0  ;;  %s1854_s18 = smov 0   ;;  %s1856_s19 = smov 0  }
   0xf   :  { %s1858_s20 = smov 0   ;;  %s1860_s21 = smov 0  }
  0x10   :  { %s1862_s22 = smov 0   ;;  %s1864_s23 = smov 0  }
  0x11   :  { %s1866_s24 = smov 0   ;;  %s1868_s25 = smov 0  }
  0x12   :  { %s1870_s26 = smov 0   ;;  %s1872_s27 = smov 0  }
  0x13   :  { %s1874_s28 = smov 0   ;;  %s1876_s29 = smov 0  }
  0x14   :  { %s1878_s30 = smov 0   ;;  %s1880_s6 = smov 0  }
  0x15   :  { %s1882_s7 = smov 0   ;;  %s1884_s8 = smov 0  }
  0x16   :  { %s1886_s9 = smov 0   ;;  %s1888_s10 = smov 0  }
  0x17   :  { %s1890_s11 = smov 0  }
  0x18 LB: > { %3229 = sst [smem:[#allocation17_spill]] %s1737_s18  ;;  %s1950_s12 = sadd.s32 4294967295, %s1809_s11   ;;  %s1809_s11 = sphi %s1890_s11, %s27_s11   ;;  %s1805_s10 = sphi %s1888_s10, %s3407_s10   ;;  %s1801_s9 = sphi %s1886_s9, %s3415_s9   ;;  %s1797_s8 = sphi %s1884_s8, %s3405_s8   ;;  %s1793_s7 = sphi %s1882_s7, %s3414_s7   ;;  %s1789_s6 = sphi %s1880_s6, %s3413_s6   ;;  %s1785_s30 = sphi %s1878_s30, %s3403_s30   ;;  %s1781_s29 = sphi %s1876_s29, %s3402_s29   ;;  %s1777_s28 = sphi %s1874_s28, %s3412_s28   ;;  %s1773_s27 = sphi %s1872_s27, %s3411_s27   ;;  %s1769_s26 = sphi %s1870_s26, %s3400_s26   ;;  %s1765_s25 = sphi %s1868_s25, %s3399_s25   ;;  %s1761_s24 = sphi %s1866_s24, %s3398_s24   ;;  %s1757_s23 = sphi %s1864_s23, %s3410_s23   ;;  %s1753_s22 = sphi %s1862_s22, %s3409_s22   ;;  %s1749_s21 = sphi %s1860_s21, %s3397_s21   ;;  %s1745_s20 = sphi %s1858_s20, %s3408_s20   ;;  %s1741_s19 = sphi %s1856_s19, %s3396_s19   ;;  %s1737_s18 = sphi %s1854_s18, %s3395_s18  }
  0x19   : > { %3230 = sst [smem:[#allocation18_spill]] %s1741_s19  ;;  %s39_s13 = sadd.s32 1, %s1797_s8 }
  0x1a   : > { %3231 = sst [smem:[#allocation19_spill]] %s1745_s20  ;;  %p40_p0 = scmp.ge.s32.totalorder %s39_s13, 2 }
  0x1b   : > { %3232 = sst [smem:[#allocation20_spill]] %s1749_s21  ;;  %s42_s14 = sadd.s32 1, %s1801_s9 }
  0x1c   : > { %3233 = sst [smem:[#allocation21_spill]] %s1753_s22  ;;  %s46_s15 = sadd.s32 1, %s1805_s10 }
  0x1d   : > { %3234 = sst [smem:[#allocation22_spill]] %s1765_s25  ;;  %p3152_p1 = scmp.eq.s32.totalorder %s1809_s11, 0 }
  0x1e   : > { %3235 = sst [smem:[#allocation23_spill]] %s1769_s26  ;;  %s3417_s13 = smov (%p40_p0, %s39_s13), 0 }
  0x1f   : > { %3236 = sst [smem:[#allocation24_spill]] %s1773_s27  ;;  %s3419_s14 = smov (!%p40_p0, %s42_s14), %s1801_s9 }
  0x20   : > { %3237 = sst [smem:[#allocation25_spill]] %s1781_s29  ;;  %s51_s16 = ssub.s32 %s1797_s8, %s3417_s13 }
  0x21   : > { %3238 = sst [smem:[#allocation26_spill]] %s1785_s30  ;;  %p3151_p2 = scmp.eq.s32.totalorder %s1950_s12, 0 }
  0x22   : > { %3239 = sst [smem:[#allocation27_spill]] %s1789_s6  ;;  %p44_p3 = scmp.ge.s32.totalorder %s3419_s14, 2 }
  0x23   : > { %3240 = sst [smem:[#allocation28_spill]] %s1793_s7  ;;  %s1258_s17 = sshll.u32 %s1797_s8, 3 }
  0x24   : > { %3241 = sst [smem:[#allocation29_spill]] %s1797_s8  ;;  %s1259_s5 = sadd.s32 4294967295, %s1258_s17 }
  0x25   : > { %3242 = sst [smem:[#allocation30_spill]] %s1805_s10  ;;  %s1260_s7 = sshll.u32 %s3417_s13, 3 }
  0x26   : > { %3243 = sst [smem:[#allocation31_spill]] %s3417_s13  ;;  %s3421_s14 = smov (%p44_p3, %s3419_s14), 0 }
  0x27   : > { %3244 = sst [smem:[#allocation32_spill]] %s3421_s14  ;;  %s3423_s15 = smov (!%p44_p3, %s46_s15), %s1805_s10 }
  0x28   : > { %s1969_s30 = ssub.s32 %s1801_s9, %s3421_s14  ;;  %p82_p4 = scmp.gt.s32.totalorder %s1259_s5, 0 }
  0x29   : > { %p48_p5 = scmp.ge.s32.totalorder %s3423_s15, 2  ;;  %s1261_s4 = sadd.s32 4294967295, %s1260_s7 }
  0x2a   : > { %s3425_s5 = smov (!%p82_p4, %s1259_s5), 0  ;;  %p86_p6 = scmp.gt.s32.totalorder %s1261_s4, 0 }
  0x2b   : > { %s3427_s15 = smov (%p48_p5, %s3423_s15), 0  ;;  %s95_s13 = sadd.s32 1, %s1769_s26 }
  0x2c   : > { %3245 = sst [smem:[#allocation33_spill]] %s3427_s15  ;;  %s1978_s6 = ssub.s32 %s1805_s10, %s3427_s15 }
  0x2d   : > { %3246 = sst [smem:[#allocation34_spill]] %s1978_s6  ;;  %p102_p7 = scmp.ne.s32.totalorder %s1769_s26, %s1765_s25 }
  0x2e   : > { %s52_s14 = sor.u32 %s51_s16, %s1978_s6  ;;  %p108_p8 = scmp.ne.s32.totalorder %s1765_s25, %s1761_s24 }
  0x2f   : > { %s54_s3 = sor.u32 %s1969_s30, %s52_s14  ;;  %p1988_p9 = por %p102_p7, %p3152_p1 }
  0x30   : > { %p1992_p10 = scmp.eq.s32.totalorder %s54_s3, 0  ;;  %p1998_p11 = por %p108_p8, %p3151_p2 }
  0x31   : > { %s3429_s4 = smov (!%p86_p6, %s1261_s4), 0  ;;  %s2002_s24 = sadd.s32 8, %s1258_s17 }
  0x32   : > { %s3249_s15 = scalar_select %p1998_p11, 1, 0 }
  0x33   : > { %s2004_s14 = sadd.s32 8, %s1260_s7  ;;  %s89_s16 = ssub.s32 %s3425_s5, %s3429_s4 }
  0x34   : > { %3250 = sst [smem:[#allocation35_spill]] %s3249_s15  ;;  %s90_s3 = sor.u32 %s89_s16, %s1978_s6 }
  0x35   : > { %s92_s25 = sor.u32 %s90_s3, %s1969_s30  ;;  %p3150_p3 = scmp.lt.s32.totalorder %s1809_s11, 8 }
  0x36   : > { %p93_p0 = scmp.eq.s32.totalorder %s92_s25, 0  ;;  %s2013_s15 = sshll.u32 %s1805_s10, 6 }
  0x37   : > { %s277_s20 = sand.u32 1, %s1809_s11   ;;  %s279_s7 = sand.u32 1, %s1769_s26  }
  0x38   : > { %s2016_s17 = scalar_select %p93_p0, %s1769_s26, %s95_s13  }
  0x39   : > { %s1271_s2 = sshll.u32 %s279_s7, 4  ;;  %s1274_s21 = sshll.u32 %s3425_s5, 2 }
  0x3a   : > { %3251 = sst [smem:[#allocation36_spill]] %s2016_s17  ;;  %s290_s4 = sadd.s32 %s1801_s9, %s1274_s21 }
  0x3b   : > { %s281_s22 = scalar_lea.vmem [#allocation6], %s1271_s2  ;;  %s292_s6 = sadd.s32 %s2013_s15, %s290_s4 }
  0x3c   : > { %s295_s16 = sshll.u32 %s281_s22, 4  ;;  %s1276_s3 = sshll.u32 %s292_s6, 7  ;;  %s2023_s16 = int_to_ptr.vmem [resolvable:$true] %s295_s16 }
  0x3d   : > { %p2029_p4 = pnand %p3150_p3, %p1988_p9  ;;  %s3253_s1 = sld [smem:[#allocation72_spill]] }
  0x3e   : > { %s2040_s2 = scalar_lea.sflag [#allocation7], %s277_s20 }
  0x3f   : > { %p1493_p8 = pneg %p2029_p4 }
  0x43   : > { %s2036_s7 = scalar_lea.hbm %s3253_s1, %s1276_s3  ;;  %s1496_s22 = scalar_lea.hbm %s3253_s1, 16384 }
  0x44   : > { %s1491_s5 = scalar_lea.hbm %s2036_s7, 256  ;;  %p1497_p13 = scmp.lt.u32.totalorder %s2036_s7, %s3253_s1 }
  0x45   : > { %p1492_p7 = scmp.ne.s32.totalorder %s2036_s7, %s1491_s5  ;;  %p1498_p12 = scmp.lt.u32.totalorder %s1496_s22, %s1491_s5 }
  0x46   : > { %p1500_p2 = scmp.lt.u32.totalorder %s1491_s5, %s2036_s7 }
  0x47   : > { %p1494_p9 = pnand %p1493_p8, %p1492_p7  ;;  %p1499_p3 = por %p1498_p12, %p1497_p13 }
  0x49   : > { %p1495_p0 = pneg %p1494_p9  ;;  %p1501_p1 = por %p1500_p2, %p1499_p3 }
  0x4b   : > { %p1502_p5 = pnand %p1501_p1, %p1495_p0 }
  0x4d   : > { %1505 = shalt.err (!%p1502_p5)
}
  0x4e   : > { %s1506_s20 = scalar_lea.vmem %s2023_s16, 256  ;;  %s1811_s4 = smov [#allocation6]  }
  0x4f   : > { %p1507_p7 = scmp.ne.s32.totalorder %s2023_s16, %s1506_s20  ;;  %s1511_s3 = sshll.u32 %s1811_s4, 4  ;;  %s1512_s3 = int_to_ptr.vmem [resolvable:$false] %s1511_s3 }
  0x50   : > { %s1513_s13 = scalar_lea.vmem %s1512_s3, 512  ;;  %p1514_p11 = scmp.lt.s32.totalorder %s2023_s16, %s1512_s3 }
  0x51   : > { %p1509_p9 = pnand %p1507_p7, %p1493_p8  ;;  %p1515_p12 = scmp.lt.s32.totalorder %s1513_s13, %s1506_s20 }
  0x53   : > { %p1510_p6 = pneg %p1509_p9  ;;  %p1516_p13 = por %p1515_p12, %p1514_p11 }
  0x55   : > { %p1517_p2 = pnand %p1516_p13, %p1510_p6 }
  0x57   : > { %1520 = shalt.err (!%p1517_p2)
}
  0x58   : > { %s3154_s5 = smov 256   ;;  %s3156_s18 = smov 128  }
  0x59   : > { %s3158_s21 = smov 8   ;;  %p3254_p1 = scmp.lt.s32.totalorder %s1809_s11, 9 }
  0x5a   : > { %1318 = dma.hbm_to_vmem [thread:$0]  (!%p2029_p4), %s2036_s7, 256, %s2023_s16, %s2040_s2, %s3154_s5, %s3156_s18, %s3158_s21  }
  0x5b   : > { %p3255_p11 = scmp.ge.s32.totalorder %s1809_s11, 1  ;;  %s1257_s6 = sadd.s32 4294967294, %s1809_s11  }
  0x5c   : > { %s57_s10 = sadd.s32 1, %s1781_s29  ;;  %p64_p5 = scmp.ne.s32.totalorder %s1781_s29, %s1777_s28 }
  0x5d   : > { %p2075_p3 = pnand %p3255_p11, %p3254_p1  ;;  %p3258_p6 = scmp.eq.s32.totalorder %s1809_s11, 0 }
  0x5e   : > { %s2086_s20 = scalar_select %p1992_p10, %s1781_s29, %s57_s10  }
  0x5f   : > { %p2090_p8 = por %p3258_p6, %p64_p5  ;;  %p70_p4 = scmp.ne.s32.totalorder %s1777_s28, %s1773_s27 }
  0x60   : > { %3257 = sst [smem:[#allocation37_spill]] %s2086_s20  ;;  %p226_p0 = scmp.eq.s32.totalorder %s1950_s12, 7 }
  0x61   : > { %p232_p7 = scmp.eq.s32.totalorder %s1257_s6, 7  ;;  %p3260_p9 = scmp.eq.s32.totalorder %s1950_s12, 0 }
  0x62   : > { %s252_s7 = sand.u32 1, %s1781_s29   ;;  %p2104_p13 = por %p226_p0, %p64_p5 }
  0x63   : > { %p2099_p12 = por %p3260_p9, %p70_p4  ;;  %p2108_p10 = por %p232_p7, %p70_p4 }
  0x64   : > { %s3263_s19 = scalar_select %p2104_p13, 1, 0 }
  0x65   : > { %s3261_s16 = scalar_select %p2099_p12, 1, 0 }
  0x66   : > { %3264 = sst [smem:[#allocation39_spill]] %s3263_s19  ;;  %s1266_s3 = sshll.u32 %s252_s7, 7 }
  0x67   : > { %3262 = sst [smem:[#allocation38_spill]] %s3261_s16  ;;  %s1298_s13 = sshll.u32 %s1797_s8, 5 }
  0x68   : > { %s3265_s4 = scalar_select %p2108_p10, 1, 0 }
  0x69   : > { %s262_s10 = sadd.s32 %s1801_s9, %s1298_s13  ;;  %s256_s5 = scalar_lea.vmem [#allocation3], %s1266_s3 }
  0x6a   : > { %3266 = sst [smem:[#allocation40_spill]] %s3265_s4  ;;  %s267_s18 = sshll.u32 %s256_s5, 4  ;;  %s2115_s18 = int_to_ptr.vmem [resolvable:$true] %s267_s18 }
  0x6b   : > { %s264_s6 = sadd.s32 %s2013_s15, %s262_s10  ;;  %p3267_p2 = scmp.lt.s32.totalorder %s1809_s11, 8 }
  0x6c   : > { %s1270_s21 = sshll.u32 %s264_s6, 7  ;;  %s3269_s0 = sld [smem:[#allocation71_spill]] }
  0x6d   : > { %p2121_p1 = pnand %p3267_p2, %p2090_p8  ;;  %s2130_s5 = scalar_lea.sflag [#allocation4], %s252_s7 }
  0x6f   : > { %p1523_p5 = pneg %p2121_p1 }
  0x72   : > { %s2128_s17 = scalar_lea.hbm %s3269_s0, %s1270_s21  ;;  %s1526_s20 = scalar_lea.hbm %s3269_s0, 16384 }
  0x73   : > { %s1521_s3 = scalar_lea.hbm %s2128_s17, 2048  ;;  %p1527_p4 = scmp.lt.u32.totalorder %s2128_s17, %s3269_s0 }
  0x74   : > { %p1522_p11 = scmp.ne.s32.totalorder %s2128_s17, %s1521_s3  ;;  %p1528_p0 = scmp.lt.u32.totalorder %s1526_s20, %s1521_s3 }
  0x75   : > { %p1530_p9 = scmp.lt.u32.totalorder %s1521_s3, %s2128_s17 }
  0x76   : > { %p1524_p6 = pnand %p1523_p5, %p1522_p11  ;;  %p1529_p7 = por %p1528_p0, %p1527_p4 }
  0x78   : > { %p1525_p8 = pneg %p1524_p6  ;;  %p1531_p2 = por %p1530_p9, %p1529_p7 }
  0x7a   : > { %p1532_p10 = pnand %p1531_p2, %p1525_p8 }
  0x7c   : > { %1535 = shalt.err (!%p1532_p10)
}
  0x7d   : > { %s1536_s7 = scalar_lea.vmem %s2115_s18, 2048  ;;  %s1815_s10 = smov [#allocation3]  }
  0x7e   : > { %p1537_p11 = scmp.ne.s32.totalorder %s2115_s18, %s1536_s7  ;;  %s1541_s6 = sshll.u32 %s1815_s10, 4  ;;  %s1542_s6 = int_to_ptr.vmem [resolvable:$false] %s1541_s6 }
  0x7f   : > { %s1543_s25 = scalar_lea.vmem %s1542_s6, 4096  ;;  %p1544_p12 = scmp.lt.s32.totalorder %s2115_s18, %s1542_s6 }
  0x80   : > { %p1539_p6 = pnand %p1537_p11, %p1523_p5  ;;  %p1545_p4 = scmp.lt.s32.totalorder %s1543_s25, %s1536_s7 }
  0x82   : > { %p1540_p13 = pneg %p1539_p6  ;;  %p1546_p0 = por %p1545_p4, %p1544_p12 }
  0x84   : > { %p1547_p7 = pnand %p1546_p0, %p1540_p13 }
  0x86   : > { %1550 = shalt.err (!%p1547_p7)
}
  0x87   : > { %s3270_s3 = smov 8   ;;  %s3271_s29 = smov 128  }
  0x88   : > { %s3272_s20 = smov 256   ;;  %s3273_s21 = sld [smem:[#allocation21_spill]] }
  0x89   : > { %s3274_s13 = sld [smem:[#allocation20_spill]]  ;;  %s3275_s7 = sld [smem:[#allocation34_spill]] }
  0x8a   : > { %1315 = dma.hbm_to_vmem [thread:$0]  (!%p2121_p1), %s2128_s17, 2048, %s2115_s18, %s2130_s5, %s3272_s20, %s3271_s29, %s3270_s3  }
  0x8b   : > { %p3276_p12 = scmp.lt.s32.totalorder %s2002_s24, 15  ;;  %p3277_p13 = scmp.lt.s32.totalorder %s2004_s14, 15 }
  0x8c   : > { %s133_s1 = sadd.s32 1, %s1757_s23  ;;  %p3278_p8 = scmp.eq.s32.totalorder %s1809_s11, 0 }
  0x8d   : > { %s3431_s24 = smov (!%p3276_p12, %s2002_s24), 15  ;;  %s3433_s14 = smov (!%p3277_p13, %s2004_s14), 15 }
  0x8e   : > { %p140_p10 = scmp.ne.s32.totalorder %s1757_s23, %s3273_s21  ;;  %s127_s10 = ssub.s32 %s3431_s24, %s3433_s14 }
  0x8f   : > { %p146_p5 = scmp.ne.s32.totalorder %s3273_s21, %s3274_s13  ;;  %s128_s6 = sor.u32 %s127_s10, %s3275_s7 }
  0x90   : > { %p2175_p9 = por %p140_p10, %p3278_p8  ;;  %s130_s0 = sor.u32 %s128_s6, %s1969_s30 }
  0x91   : > { %p3280_p1 = scmp.eq.s32.totalorder %s1950_s12, 0  ;;  %p131_p11 = scmp.eq.s32.totalorder %s130_s0, 0 }
  0x92   : > { %s307_s18 = sand.u32 1, %s1757_s23   ;;  %s1279_s8 = sshll.u32 %s3431_s24, 2 }
  0x93   : > { %p2182_p2 = por %p146_p5, %p3280_p1  ;;  %s1277_s5 = sshll.u32 %s307_s18, 4 }
  0x94   : > { %s2188_s14 = scalar_select %p131_p11, %s1757_s23, %s133_s1  }
  0x95   : > { %s3281_s17 = scalar_select %p2182_p2, 1, 0 }
  0x96   : > { %s318_s21 = sadd.s32 %s1801_s9, %s1279_s8  ;;  %s309_s7 = scalar_lea.vmem [#allocation8], %s1277_s5 }
  0x97   : > { %s320_s13 = sadd.s32 %s2013_s15, %s318_s21  ;;  %s323_s10 = sshll.u32 %s309_s7, 4  ;;  %s2192_s10 = int_to_ptr.vmem [resolvable:$true] %s323_s10 }
  0x98   : > { %s1281_s26 = sshll.u32 %s320_s13, 7  ;;  %s3282_s27 = sld [smem:[#allocation73_spill]] }
  0x99   : > { %p3284_p6 = scmp.lt.s32.totalorder %s1809_s11, 8 }
  0x9b   : > { %p2203_p4 = pnand %p3284_p6, %p2175_p9 }
  0x9d   : > { %p1553_p7 = pneg %p2203_p4 }
  0x9e   : > { %s3283_s16 = smov %s3282_s27  ;;  %s2197_s19 = scalar_lea.hbm %s3282_s27, %s1281_s26 }
  0x9f   : > { %s1551_s8 = scalar_lea.hbm %s2197_s19, 256  ;;  %s1556_s15 = scalar_lea.hbm %s3283_s16, 16384 }
  0xa0   : > { %p1552_p0 = scmp.ne.s32.totalorder %s2197_s19, %s1551_s8  ;;  %p1557_p10 = scmp.lt.u32.totalorder %s2197_s19, %s3283_s16 }
  0xa1   : > { %p1558_p5 = scmp.lt.u32.totalorder %s1556_s15, %s1551_s8  ;;  %p1560_p9 = scmp.lt.u32.totalorder %s1551_s8, %s2197_s19 }
  0xa2   : > { %p1554_p12 = pnand %p1553_p7, %p1552_p0 }
  0xa3   : > { %p1559_p8 = por %p1558_p5, %p1557_p10 }
  0xa4   : > { %p1555_p13 = pneg %p1554_p12 }
  0xa5   : > { %p1561_p1 = por %p1560_p9, %p1559_p8 }
  0xa7   : > { %p1562_p11 = pnand %p1561_p1, %p1555_p13 }
  0xa9   : > { %1565 = shalt.err (!%p1562_p11)
}
  0xaa   : > { %s1566_s1 = scalar_lea.vmem %s2192_s10, 256  ;;  %s1816_s25 = smov [#allocation8]  }
  0xab   : > { %p1567_p6 = scmp.ne.s32.totalorder %s2192_s10, %s1566_s1  ;;  %s1571_s18 = sshll.u32 %s1816_s25, 4  ;;  %s1572_s18 = int_to_ptr.vmem [resolvable:$false] %s1571_s18 }
  0xac   : > { %s1573_s5 = scalar_lea.vmem %s1572_s18, 512  ;;  %p1574_p2 = scmp.lt.s32.totalorder %s2192_s10, %s1572_s18 }
  0xad   : > { %p1569_p0 = pnand %p1567_p6, %p1553_p7  ;;  %p1575_p10 = scmp.lt.s32.totalorder %s1573_s5, %s1566_s1 }
  0xaf   : > { %p1570_p12 = pneg %p1569_p0  ;;  %p1576_p5 = por %p1575_p10, %p1574_p2 }
  0xb1   : > { %p1577_p8 = pnand %p1576_p5, %p1570_p12 }
  0xb3   : > { %1580 = shalt.err (!%p1577_p8)
}
  0xb4   : > { %s3286_s21 = sld [smem:[#allocation19_spill]]  ;;  %s3287_s13 = sld [smem:[#allocation18_spill]] }
  0xb5   : > { %s3288_s7 = sld [smem:[#allocation17_spill]]  ;;  %p157_p2 = scmp.eq.s32.totalorder %s1969_s30, 0 }
  0xb6   : > { %1321 = dma.hbm_to_vmem [thread:$0]  (!%p2203_p4), %s2197_s19, 256, %s2192_s10, %s2040_s2, %s3272_s20, %s3271_s29, %s3270_s3  }
  0xb7   : > { %p3289_p13 = scmp.eq.s32.totalorder %s1809_s11, 0  ;;  %s1282_s26 = sshll.u32 %s1801_s9, 6 }
  0xb8   : > { %p3290_p11 = scmp.eq.s32.totalorder %s1950_s12, 0  ;;  %s3292_s1 = sld [smem:[#allocation74_spill]] }
  0xb9   : > { %p3293_p4 = scmp.lt.s32.totalorder %s1809_s11, 8 }
  0xba   : > { %s159_s6 = sadd.s32 1, %s3286_s21  ;;  %p166_p7 = scmp.ne.s32.totalorder %s3286_s21, %s3287_s13 }
  0xbb   : > { %s2241_s0 = scalar_select %p157_p2, %s3286_s21, %s159_s6  }
  0xbc   : > { %p168_p9 = por %p166_p7, %p3289_p13  ;;  %p172_p1 = scmp.ne.s32.totalorder %s3287_s13, %s3288_s7 }
  0xbd   : > { %s333_s8 = sand.u32 1, %s3286_s21  }
  0xbe   : > { %p2251_p6 = por %p172_p1, %p3290_p11  ;;  %s1300_s15 = smul.u32 12, %s333_s8 }
  0xbf   : > { %s2258_s2 = scalar_lea.hbm %s3292_s1, %s1282_s26  ;;  %p2262_p0 = pnand %p3293_p4, %p168_p9 }
  0xc0   : > { %s3291_s27 = scalar_select %p2251_p6, 1, 0 }
  0xc1   : > { %s337_s19 = scalar_lea.vmem [#allocation9], %s1300_s15  ;;  %s2268_s20 = scalar_lea.sflag [#allocation10], %s333_s8 }
  0xc2   : > { %s343_s3 = sshll.u32 %s337_s19, 4  ;;  %s1581_s10 = scalar_lea.hbm %s2258_s2, 192  ;;  %s2266_s3 = int_to_ptr.vmem [resolvable:$true] %s343_s3 }
  0xc3   : > { %p1582_p12 = scmp.ne.s32.totalorder %s2258_s2, %s1581_s10  ;;  %p1583_p10 = pneg %p2262_p0 }
  0xc4   : > { %s1586_s5 = scalar_lea.hbm %s3292_s1, 384  ;;  %p1587_p2 = scmp.lt.u32.totalorder %s2258_s2, %s3292_s1 }
  0xc5   : > { %p1584_p5 = pnand %p1583_p10, %p1582_p12  ;;  %p1588_p7 = scmp.lt.u32.totalorder %s1586_s5, %s1581_s10 }
  0xc6   : > { %p1590_p9 = scmp.lt.u32.totalorder %s1581_s10, %s2258_s2 }
  0xc7   : > { %p1585_p8 = pneg %p1584_p5  ;;  %p1589_p13 = por %p1588_p7, %p1587_p2 }
  0xc9   : > { %p1591_p1 = por %p1590_p9, %p1589_p13 }
  0xcb   : > { %p1592_p11 = pnand %p1591_p1, %p1585_p8 }
  0xcd   : > { %1595 = shalt.err (!%p1592_p11)
}
  0xce   : > { %s1596_s7 = scalar_lea.vmem %s2266_s3, 192  ;;  %s1817_s6 = smov [#allocation9]  }
  0xcf   : > { %p1597_p4 = scmp.ne.s32.totalorder %s2266_s3, %s1596_s7  ;;  %s1601_s8 = sshll.u32 %s1817_s6, 4  ;;  %s1602_s8 = int_to_ptr.vmem [resolvable:$false] %s1601_s8 }
  0xd0   : > { %s1603_s26 = scalar_lea.vmem %s1602_s8, 384  ;;  %p1604_p6 = scmp.lt.s32.totalorder %s2266_s3, %s1602_s8 }
  0xd1   : > { %p1599_p12 = pnand %p1597_p4, %p1583_p10  ;;  %p1605_p2 = scmp.lt.s32.totalorder %s1603_s26, %s1596_s7 }
  0xd3   : > { %p1600_p5 = pneg %p1599_p12  ;;  %p1606_p7 = por %p1605_p2, %p1604_p6 }
  0xd5   : > { %p1607_p13 = pnand %p1606_p7, %p1600_p5 }
  0xd7   : > { %1610 = shalt.err (!%p1607_p13)
}
  0xd8   : > { %s1818_s15 = smov 64   ;;  %s1819_s24 = smov 4  }
  0xd9   : > { %1324 = dma.hbm_to_vmem [thread:$0]  (!%p2262_p0), %s2258_s2, 192, %s2266_s3, %s2268_s20, %s3271_s29, %s1818_s15, %s1819_s24  }
  0xda   : > { %361 = sbr.rel (%p2075_p3) target bundleno = 420 (0x1a4), region = 40 }
  0xe1   : > { %s3295_s4 = sld [smem:[#allocation38_spill]]  ;;  %s2300_s19 = sand.u32 1, %s1777_s28  }
  0xe2   : > { %s1284_s10 = sshll.u32 %s2300_s19, 7  ;;  %s364_s25 = scalar_lea.sflag [#allocation4], %s2300_s19 }
  0xe3   : > { %s2306_s18 = scalar_lea.vmem [#allocation3], %s1284_s10 }
  0xe7   : > { %p3296_p6 = scmp.ne.s32.totalorder %s3295_s4, 0 }
  0xe9   : > { %1716 = dma.done.wait (%p3296_p6), %s364_s25, 2048  }
  0xea   : > { %1718 = vsyncadd (%p3296_p6), %s364_s25, 4294965248  ;;  %s3297_s22 = sld [smem:[#allocation22_spill]]  ;;  %s3298_s29 = sld [smem:[#allocation35_spill]] }
  0xeb   : > { %s372_s2 = sand.u32 1, %s1950_s12  }
  0xec   : > { %s373_s20 = scalar_lea.sflag [#allocation7], %s372_s2 }
  0xf0   : > { %s374_s30 = sand.u32 1, %s3297_s22   ;;  %p3299_p3 = scmp.ne.s32.totalorder %s3298_s29, 0 }
  0xf1   : > { %s2314_s3 = sshll.u32 %s374_s30, 4 }
  0xf2   : > { %s376_s5 = scalar_lea.vmem [#allocation6], %s2314_s3 }
  0xf3   : > { %1720 = dma.done.wait (%p3299_p3), %s373_s20, 256  }
  0xf4   : > { %1722 = vsyncadd (%p3299_p3), %s373_s20, 4294967040  ;;  %s3300_s21 = sld [smem:[#allocation21_spill]]  ;;  %p3301_p0 = scmp.ne.s32.totalorder %s3281_s17, 0 }
  0xfa   : > { %s383_s13 = sand.u32 1, %s3300_s21  }
  0xfb   : > { %s2322_s7 = sshll.u32 %s383_s13, 4 }
  0xfc   : > { %s385_s6 = scalar_lea.vmem [#allocation8], %s2322_s7 }
  0xfd   : > { %1724 = dma.done.wait (%p3301_p0), %s373_s20, 256  }
  0xfe   : > { %1726 = vsyncadd (%p3301_p0), %s373_s20, 4294967040  ;;  %s3302_s12 = sld [smem:[#allocation18_spill]]  ;;  %p3303_p10 = scmp.ne.s32.totalorder %s3291_s27, 0 }
 0x104   : > { %s390_s8 = sand.u32 1, %s3302_s12  }
 0x105   : > { %s1301_s26 = smul.u32 12, %s390_s8  ;;  %s391_s15 = scalar_lea.sflag [#allocation10], %s390_s8 }
 0x107   : > { %s394_s24 = scalar_lea.vmem [#allocation9], %s1301_s26 }
 0x108   : > { %1728 = dma.done.wait (%p3303_p10), %s391_s15, 192  }
 0x109   : > { %1730 = vsyncadd (%p3303_p10), %s391_s15, 4294967104  ;;  %s3304_s4 = sld [smem:[#allocation27_spill]]  ;;  %v488_v0 = vlaneseq  ;;  %v452_v5 = vld [vmem:[%s394_s24] sm:$0x7]  ;;  %v453_v6 = vld [vmem:[%s394_s24 + $0x4] sm:$0x7] }
 0x10a   : > { %v454_v7 = vld [vmem:[%s394_s24 + $0x8] sm:$0x7]  ;;  %v2347_v9 = vld [vmem:[%s2306_s18 + $0x18] sm:$0xff]  ;;  %v2384_v25 = vld [vmem:[%s2306_s18 + $0x20] sm:$0xff]  ;;  %s3310_s25 = sld [smem:[#allocation75_spill]]  ;;  %s3374_s29 = sld [smem:[#allocation26_spill]] }
 0x10b   : > { %v2334_v1 = vshrl.u32 %v488_v0, 7  ;;  %v2344_v8 = vld [vmem:[%s2306_s18 + $0x10] sm:$0xff]  ;;  %v481_v15 = vrot.slane %v2347_v9, 7  ;;  %v535_v17 = vrot.slane %v2347_v9, 1  ;;  %v2387_v26 = vld [vmem:[%s2306_s18 + $0x28] sm:$0xff]  ;;  %v474_v35 = vrot.slane %v2384_v25, 7 }
 0x10c   : > { %v473_v14 = vrot.slane %v2344_v8, 7  ;;  %v527_v16 = vrot.slane %v2344_v8, 1  ;;  %v482_v36 = vrot.slane %v2387_v26, 7  ;;  %v528_v37 = vrot.slane %v2384_v25, 1  ;;  %v2433_v46 = vld [vmem:[%s2306_s18 + $0x30] sm:$0xff]  ;;  %v2446_v51 = vld [vmem:[%s2306_s18 + $0x38] sm:$0xff] }
 0x10d   : > { %3305 = vst [vmem:[#allocation41_spill] sm:$0xff] %v2334_v1  ;;  %v579_v2 = vsub.s32 1, %v2334_v1  ;;  %v599_v3 = vsub.s32 0, %v2334_v1  ;;  %v635_v4 = vsub.s32 2, %v2334_v1  ;;  %vm490_vm0 = vcmp.lt.s32.totalorder %v2334_v1, 1 }
 0x10e   : > { %vm508_vm1 = vcmp.eq.s32.totalorder %v2334_v1, 0  ;;  %vm542_vm2 = vcmp.lt.s32.totalorder %v2334_v1, 7  ;;  %v2356_v13 = vadd.s32 8, %v2334_v1  ;;  %v500_v21 = vsel %vm490_vm0, %v481_v15, %v473_v14 }
 0x10f   : > { %p448_p8 = scmp.lt.s32.totalorder %s3304_s4, 1  ;;  %v2349_v10 = vrot.slane %v453_v6, %v579_v2  ;;  %v2351_v11 = vrot.slane %v453_v6, %v599_v3  ;;  %v2353_v12 = vrot.slane %v453_v6, %v635_v4  ;;  %v2364_v19 = vrot.slane %v452_v5, %v579_v2 }
 0x110   : > { %3306 = vst [vmem:[#allocation42_spill] sm:$0xff] %v2356_v13  ;;  %v2366_v20 = vrot.slane %v452_v5, %v599_v3  ;;  %v2377_v22 = vsel %vm542_vm2, %v527_v16, %v535_v17  ;;  %v2379_v23 = vrot.slane %v452_v5, %v635_v4  ;;  %v2381_v24 = vrot.slane %v454_v7, %v579_v2  ;;  %p1289_p9 = scmp.le.s32.totalorder %s3374_s29, 0 }
 0x111   : > { %v583_v18 = vmul.f32 %v2349_v10, %v2344_v8  ;;  %3307 = vst [vmem:[#allocation43_spill] sm:$0xff] %v2364_v19  ;;  %s3435_s4 = smov (!%p448_p8, %s3304_s4), 1  ;;  %v2391_v27 = vsel %vm508_vm1, 0.0, %v500_v21  ;;  %v639_v28 = vmul.f32 %v2353_v12, %v2377_v22  ;;  %v2397_v29 = vsel %vm490_vm0, %v473_v14, %v481_v15 }
 0x112   : > { %3308 = vst [vmem:[#allocation44_spill] sm:$0xff] %v2366_v20  ;;  %3309 = vst [vmem:[#allocation45_spill] sm:$0xff] %v2381_v24  ;;  %v552_v30 = vsel %vm542_vm2, %v535_v17, %v527_v16  ;;  %v603_v31 = vmul.f32 %v2351_v11, %v2391_v27  ;;  %vm560_vm3 = vcmp.eq.s32.totalorder %v2356_v13, 15  ;;  %v584_v32 = vmul.f32 %v2349_v10, %v2347_v9  ;;  %s450_s22 = scalar_lea.vmem %s3310_s25, %s3435_s4  ;;  %v2487_v16 = vld [vmem:[%s2306_s18 + $0x40] sm:$0xff]  ;;  %v2490_v17 = vld [vmem:[%s2306_s18 + $0x48] sm:$0xff] }
 0x113   : > { %v604_v33 = vmul.f32 %v2351_v11, %v2397_v29  ;;  %v2410_v34 = vsel %vm560_vm3, 0.0, %v552_v30  ;;  %v536_v41 = vrot.slane %v2387_v26, 1  ;;  %v501_v42 = vsel %vm490_vm0, %v482_v36, %v474_v35  ;;  %v2448_v52 = vld [vmem:[%s450_s22] ss:$0 sm:$0xff]  ;;  %3313 = vst [vmem:[#allocation48_spill] sm:$0xff] %v2490_v17 }
 0x114   : > { %v619_v38 = vadd.f32 %v603_v31, %v583_v18  ;;  %v640_v40 = vmul.f32 %v2353_v12, %v2410_v34  ;;  %v585_v43 = vmul.f32 %v2349_v10, %v2384_v25  ;;  %v2428_v44 = vsel %vm490_vm0, %v474_v35, %v482_v36 }
 0x115   : > { %v620_v39 = vadd.f32 %v604_v33, %v584_v32  ;;  %v586_v45 = vmul.f32 %v2349_v10, %v2387_v26  ;;  %v2435_v48 = vrot.slane %v454_v7, %v599_v3  ;;  %v2439_v49 = vsel %vm508_vm1, 0.0, %v501_v42 }
 0x116   : > { %v655_v47 = vadd.f32 %v639_v28, %v619_v38  ;;  %v2443_v50 = vsel %vm542_vm2, %v528_v37, %v536_v41  ;;  %v605_v54 = vmul.f32 %v2351_v11, %v2439_v49  ;;  %v553_v55 = vsel %vm542_vm2, %v536_v41, %v528_v37 }
 0x117   : > { %3311 = vst [vmem:[#allocation46_spill] sm:$0xff] %v2435_v48  ;;  %v656_v53 = vadd.f32 %v640_v40, %v620_v39  ;;  %v606_v56 = vmul.f32 %v2351_v11, %v2428_v44  ;;  %v2456_v57 = vrot.slane %v454_v7, %v635_v4  ;;  %v641_v58 = vmul.f32 %v2353_v12, %v2443_v50 }
 0x118   : > { %v2462_v59 = vsel %vm560_vm3, 0.0, %v553_v55  ;;  %v475_v60 = vrot.slane %v2433_v46, 7  ;;  %v621_v61 = vadd.f32 %v605_v54, %v585_v43  ;;  %v483_v0 = vrot.slane %v2446_v51, 7  ;;  %v2529_v55 = vld [vmem:[%s2306_s18 + $0x50] sm:$0xff] }
 0x119   : > { %3312 = vst [vmem:[#allocation47_spill] sm:$0xff] %v2456_v57  ;;  %v622_v62 = vadd.f32 %v606_v56, %v586_v45  ;;  %v642_v63 = vmul.f32 %v2353_v12, %v2462_v59  ;;  %v2469_v2 = vadd.f32 %v2448_v52, %v655_v47  ;;  %v529_v3 = vrot.slane %v2433_v46, 1  ;;  %3315 = vst [vmem:[#allocation50_spill] sm:$0xff] %v2529_v55 }
 0x11a   : > { %v537_v4 = vrot.slane %v2446_v51, 1  ;;  %v588_v5 = vmul.f32 %v2349_v10, %v2446_v51  ;;  %v2476_v6 = vadd.f32 %v2448_v52, %v656_v53  ;;  %v502_v7 = vsel %vm490_vm0, %v483_v0, %v475_v60 }
 0x11b   : > { %v587_v14 = vmul.f32 %v2349_v10, %v2433_v46  ;;  %v2484_v15 = vsel %vm490_vm0, %v475_v60, %v483_v0  ;;  %v2494_v18 = vsel %vm508_vm1, 0.0, %v502_v7  ;;  %v657_v31 = vadd.f32 %v641_v58, %v621_v61 }
 0x11c   : > { %v2498_v21 = vsel %vm542_vm2, %v529_v3, %v537_v4  ;;  %v554_v28 = vsel %vm542_vm2, %v537_v4, %v529_v3  ;;  %v608_v30 = vmul.f32 %v2351_v11, %v2484_v15  ;;  %v658_v32 = vadd.f32 %v642_v63, %v622_v62  ;;  %v2543_v62 = vld [vmem:[%s2306_s18 + $0x58] sm:$0xff] }
 0x11d   : > { %v607_v33 = vmul.f32 %v2351_v11, %v2494_v18  ;;  %v643_v35 = vmul.f32 %v2353_v12, %v2498_v21  ;;  %v2510_v36 = vsel %vm560_vm3, 0.0, %v554_v28  ;;  %v476_v38 = vrot.slane %v2487_v16, 7  ;;  %3316 = vst [vmem:[#allocation51_spill] sm:$0xff] %v2543_v62 }
 0x11e   : > { %v624_v37 = vadd.f32 %v608_v30, %v588_v5  ;;  %v484_v39 = vrot.slane %v2490_v17, 7  ;;  %v644_v41 = vmul.f32 %v2353_v12, %v2510_v36  ;;  %v530_v42 = vrot.slane %v2487_v16, 1 }
 0x11f   : > { %v623_v40 = vadd.f32 %v607_v33, %v587_v14  ;;  %v538_v43 = vrot.slane %v2490_v17, 1  ;;  %v589_v47 = vmul.f32 %v2349_v10, %v2487_v16  ;;  %v590_v54 = vmul.f32 %v2349_v10, %v2490_v17 }
 0x120   : > { %v503_v45 = vsel %vm490_vm0, %v484_v39, %v476_v38  ;;  %v2524_v53 = vsel %vm490_vm0, %v476_v38, %v484_v39  ;;  %v2532_v56 = vadd.f32 %v2448_v52, %v657_v31  ;;  %v660_v63 = vadd.f32 %v644_v41, %v624_v37 }
 0x121   : > { %3314 = vst [vmem:[#allocation49_spill] sm:$0xff] %v2524_v53  ;;  %v659_v58 = vadd.f32 %v643_v35, %v623_v40  ;;  %v2536_v60 = vsel %vm508_vm1, 0.0, %v503_v45  ;;  %v2540_v61 = vsel %vm542_vm2, %v530_v42, %v538_v43  ;;  %v555_v3 = vsel %vm542_vm2, %v538_v43, %v530_v42  ;;  %v2583_v45 = vld [vmem:[%s2306_s18 + $0x60] sm:$0xff] }
 0x122   : > { %v609_v0 = vmul.f32 %v2351_v11, %v2536_v60  ;;  %v610_v4 = vmul.f32 %v2351_v11, %v2524_v53  ;;  %v2552_v5 = vadd.f32 %v2448_v52, %v658_v32  ;;  %v645_v7 = vmul.f32 %v2353_v12, %v2540_v61  ;;  %3319 = vst [vmem:[#allocation54_spill] sm:$0xff] %v2583_v45 }
 0x123   : > { %v2558_v14 = vsel %vm560_vm3, 0.0, %v555_v3  ;;  %v477_v28 = vrot.slane %v2529_v55, 7  ;;  %v485_v35 = vrot.slane %v2543_v62, 7  ;;  %v2565_v32 = vadd.f32 %v2448_v52, %v659_v58 }
 0x124   : > { %3317 = vst [vmem:[#allocation52_spill] sm:$0xff] %v2558_v14  ;;  %v625_v30 = vadd.f32 %v609_v0, %v589_v47  ;;  %v626_v31 = vadd.f32 %v610_v4, %v590_v54  ;;  %v646_v33 = vmul.f32 %v2353_v12, %v2558_v14  ;;  %v531_v37 = vrot.slane %v2529_v55, 1  ;;  %v2586_v47 = vld [vmem:[%s2306_s18 + $0x68] sm:$0xff] }
 0x125   : > { %v539_v38 = vrot.slane %v2543_v62, 1  ;;  %v592_v39 = vmul.f32 %v2349_v10, %v2543_v62  ;;  %v2572_v40 = vadd.f32 %v2448_v52, %v660_v63  ;;  %v504_v41 = vsel %vm490_vm0, %v485_v35, %v477_v28  ;;  %3320 = vst [vmem:[#allocation55_spill] sm:$0xff] %v2586_v47 }
 0x126   : > { %v591_v42 = vmul.f32 %v2349_v10, %v2529_v55  ;;  %v2580_v43 = vsel %vm490_vm0, %v477_v28, %v485_v35  ;;  %v2590_v54 = vsel %vm508_vm1, 0.0, %v504_v41  ;;  %v661_v3 = vadd.f32 %v645_v7, %v625_v30 }
 0x127   : > { %3318 = vst [vmem:[#allocation53_spill] sm:$0xff] %v2580_v43  ;;  %3321 = vst [vmem:[#allocation56_spill] sm:$0xff] %v2590_v54  ;;  %v2594_v58 = vsel %vm542_vm2, %v531_v37, %v539_v38  ;;  %v556_v63 = vsel %vm542_vm2, %v539_v38, %v531_v37  ;;  %v612_v0 = vmul.f32 %v2351_v11, %v2580_v43  ;;  %v478_v37 = vrot.slane %v2583_v45, 7 }
 0x128   : > { %3322 = vst [vmem:[#allocation57_spill] sm:$0xff] %v2594_v58  ;;  %v662_v4 = vadd.f32 %v646_v33, %v626_v31  ;;  %v611_v28 = vmul.f32 %v2351_v11, %v2590_v54  ;;  %v647_v35 = vmul.f32 %v2353_v12, %v2594_v58  ;;  %v2606_v41 = vsel %vm560_vm3, 0.0, %v556_v63 }
 0x129   : > { %3323 = vst [vmem:[#allocation58_spill] sm:$0xff] %v2606_v41  ;;  %v628_v57 = vadd.f32 %v612_v0, %v592_v39  ;;  %v486_v38 = vrot.slane %v2586_v47, 7  ;;  %v648_v7 = vmul.f32 %v2353_v12, %v2606_v41  ;;  %v532_v30 = vrot.slane %v2583_v45, 1  ;;  %v2625_v0 = vld [vmem:[%s2306_s18] sm:$0xff] }
 0x12a   : > { %v627_v48 = vadd.f32 %v611_v28, %v591_v42  ;;  %v540_v31 = vrot.slane %v2586_v47, 1  ;;  %v593_v63 = vmul.f32 %v2349_v10, %v2583_v45  ;;  %v594_v42 = vmul.f32 %v2349_v10, %v2586_v47 }
 0x12b   : > { %v505_v33 = vsel %vm490_vm0, %v486_v38, %v478_v37  ;;  %v2620_v39 = vsel %vm490_vm0, %v478_v37, %v486_v38  ;;  %v2628_v28 = vadd.f32 %v2448_v52, %v661_v3  ;;  %v2631_v24 = vadd.f32 %v2448_v52, %v662_v4  ;;  %v2642_v37 = vld [vmem:[%s2306_s18 + $0x8] sm:$0xff] }
 0x12c   : > { %3324 = vst [vmem:[#allocation59_spill] sm:$0xff] %v2620_v39  ;;  %v2635_v41 = vsel %vm508_vm1, 0.0, %v505_v33  ;;  %v2639_v45 = vsel %vm542_vm2, %v532_v30, %v540_v31  ;;  %v557_v4 = vsel %vm542_vm2, %v540_v31, %v532_v30  ;;  %v614_v47 = vmul.f32 %v2351_v11, %v2620_v39 }
 0x12d   : > { %3325 = vst [vmem:[#allocation60_spill] sm:$0xff] %v2635_v41  ;;  %3326 = vst [vmem:[#allocation61_spill] sm:$0xff] %v2639_v45  ;;  %v613_v38 = vmul.f32 %v2351_v11, %v2635_v41  ;;  %v649_v3 = vmul.f32 %v2353_v12, %v2639_v45  ;;  %v663_v33 = vadd.f32 %v647_v35, %v627_v48  ;;  %v2654_v62 = vsel %vm560_vm3, 0.0, %v557_v4 }
 0x12e   : > { %v664_v43 = vadd.f32 %v648_v7, %v628_v57  ;;  %3327 = vst [vmem:[#allocation62_spill] sm:$0xff] %v2654_v62  ;;  %v472_v58 = vrot.slane %v2625_v0, 7  ;;  %v630_v41 = vadd.f32 %v614_v47, %v594_v42  ;;  %v650_v45 = vmul.f32 %v2353_v12, %v2654_v62  ;;  %v2671_v42 = vld [vmem:[%s2306_s18 + $0x70] sm:$0xff] }
 0x12f   : > { %v629_v54 = vadd.f32 %v613_v38, %v593_v63  ;;  %v480_v30 = vrot.slane %v2642_v37, 7  ;;  %v526_v31 = vrot.slane %v2625_v0, 1  ;;  %v534_v48 = vrot.slane %v2642_v37, 1  ;;  %3328 = vst [vmem:[#allocation63_spill] sm:$0xff] %v2671_v42 }
 0x130   : > { %v581_v57 = vmul.f32 %v2349_v10, %v2625_v0  ;;  %v582_v35 = vmul.f32 %v2349_v10, %v2642_v37  ;;  %v666_v4 = vadd.f32 %v650_v45, %v630_v41  ;;  %v2681_v45 = vld [vmem:[%s2306_s18 + $0x78] sm:$0xff]  ;;  %v2684_v41 = vadd.f32 %v2448_v52, %v663_v33  ;;  %s2963_s18 = scalar_lea.vmem [#allocation11], %s1284_s10 }
 0x131   : > { %v665_v7 = vadd.f32 %v649_v3, %v629_v54  ;;  %v499_v47 = vsel %vm490_vm0, %v480_v30, %v472_v58  ;;  %v491_v63 = vsel %vm490_vm0, %v472_v58, %v480_v30  ;;  %v543_v62 = vsel %vm542_vm2, %v526_v31, %v534_v48  ;;  %3329 = vst [vmem:[#allocation64_spill] sm:$0xff] %v2681_v45 }
 0x132   : > { %v510_v38 = vsel %vm508_vm1, 0.0, %v499_v47  ;;  %v551_v39 = vsel %vm542_vm2, %v534_v48, %v526_v31  ;;  %v602_v54 = vmul.f32 %v2351_v11, %v491_v63  ;;  %v2687_v58 = vadd.f32 %v2448_v52, %v664_v43 }
 0x133   : > { %v601_v3 = vmul.f32 %v2351_v11, %v510_v38  ;;  %v637_v30 = vmul.f32 %v2353_v12, %v543_v62  ;;  %v2692_v47 = vadd.f32 %v2448_v52, %v665_v7  ;;  %v562_v31 = vsel %vm560_vm3, 0.0, %v551_v39 }
 0x134   : > { %3330 = vst [vmem:[#allocation65_spill] sm:$0xff] %v2687_v58  ;;  %v618_v48 = vadd.f32 %v602_v54, %v582_v35  ;;  %v479_v55 = vrot.slane %v2671_v42, 7  ;;  %v2698_v14 = vadd.f32 %v2448_v52, %v666_v4  ;;  %v638_v43 = vmul.f32 %v2353_v12, %v562_v31 }
 0x135   : > { %v617_v33 = vadd.f32 %v601_v3, %v581_v57  ;;  %v487_v58 = vrot.slane %v2681_v45, 7  ;;  %v533_v53 = vrot.slane %v2671_v42, 1  ;;  %v541_v17 = vrot.slane %v2681_v45, 1 }
 0x136   : > { %3331 = vst [vmem:[#allocation66_spill] sm:$0xff] %v2698_v14  ;;  %v595_v7 = vmul.f32 %v2349_v10, %v2671_v42  ;;  %v596_v39 = vmul.f32 %v2349_v10, %v2681_v45  ;;  %v654_v54 = vadd.f32 %v638_v43, %v618_v48  ;;  %v790_v48 = vmul.f32 %v2379_v23, %v543_v62 }
 0x137   : > { %v653_v35 = vadd.f32 %v637_v30, %v617_v33  ;;  %v506_v4 = vsel %vm490_vm0, %v487_v58, %v479_v55  ;;  %v2712_v57 = vsel %vm490_vm0, %v479_v55, %v487_v58  ;;  %v2720_v14 = vsel %vm542_vm2, %v533_v53, %v541_v17 }
 0x138   : > { %3332 = vst [vmem:[#allocation67_spill] sm:$0xff] %v2712_v57  ;;  %v2716_v3 = vsel %vm508_vm1, 0.0, %v506_v4  ;;  %3334 = vst [vmem:[#allocation69_spill] sm:$0xff] %v2720_v14  ;;  %v558_v10 = vsel %vm542_vm2, %v541_v17, %v533_v53  ;;  %v616_v30 = vmul.f32 %v2351_v11, %v2712_v57  ;;  %v791_v33 = vmul.f32 %v2379_v23, %v562_v31 }
 0x139   : > { %3333 = vst [vmem:[#allocation68_spill] sm:$0xff] %v2716_v3  ;;  %v615_v55 = vmul.f32 %v2351_v11, %v2716_v3  ;;  %v651_v58 = vmul.f32 %v2353_v12, %v2720_v14  ;;  %v2733_v43 = vadd.f32 %v2448_v52, %v653_v35  ;;  %v2737_v4 = vsel %vm560_vm3, 0.0, %v558_v10  ;;  %v3346_v14 = vld [vmem:[#allocation53_spill] sm:$0xff]  ;;  %v3347_v3 = vld [vmem:[#allocation58_spill] sm:$0xff] }
 0x13a   : > { %3335 = vst [vmem:[#allocation70_spill] sm:$0xff] %v2737_v4  ;;  %v632_v17 = vadd.f32 %v616_v30, %v596_v39  ;;  %v726_v53 = vmul.f32 %v2364_v19, %v2625_v0  ;;  %v2742_v62 = vadd.f32 %v2448_v52, %v654_v54  ;;  %v652_v11 = vmul.f32 %v2353_v12, %v2737_v4 }
 0x13b   : > { %v631_v31 = vadd.f32 %v615_v55, %v595_v7  ;;  %v758_v1 = vmul.f32 %v2366_v20, %v510_v38  ;;  %v727_v13 = vmul.f32 %v2364_v19, %v2642_v37  ;;  %v759_v10 = vmul.f32 %v2366_v20, %v491_v63 }
 0x13c   : > { %v740_v35 = vadd.f32 %v726_v53, %v2469_v2  ;;  %v728_v39 = vmul.f32 %v2364_v19, %v2344_v8  ;;  %v668_v30 = vadd.f32 %v652_v11, %v632_v17  ;;  %v760_v7 = vmul.f32 %v2366_v20, %v2391_v27 }
 0x13d   : > { %v667_v0 = vadd.f32 %v651_v58, %v631_v31  ;;  %v792_v12 = vmul.f32 %v2379_v23, %v2377_v22  ;;  %v741_v38 = vadd.f32 %v727_v13, %v2476_v6  ;;  %v729_v37 = vmul.f32 %v2364_v19, %v2347_v9 }
 0x13e   : > { %v772_v54 = vadd.f32 %v758_v1, %v740_v35  ;;  %v742_v2 = vadd.f32 %v728_v39, %v2532_v56  ;;  %v2763_v55 = vadd.f32 %v2448_v52, %v668_v30  ;;  %v761_v58 = vmul.f32 %v2366_v20, %v2397_v29 }
 0x13f   : > { %v689_v63 = vadd.f32 %v2448_v52, %v667_v0  ;;  %v793_v17 = vmul.f32 %v2379_v23, %v2410_v34  ;;  %v773_v1 = vadd.f32 %v759_v10, %v741_v38  ;;  %v743_v6 = vadd.f32 %v729_v37, %v2552_v5 }
 0x140   : > { %v2769_v53 = vadd.f32 %v790_v48, %v772_v54  ;;  %v774_v13 = vadd.f32 %v760_v7, %v742_v2  ;;  %v730_v56 = vmul.f32 %v2364_v19, %v2384_v25  ;;  %v762_v31 = vmul.f32 %v2366_v20, %v2439_v49 }
 0x141   : > { %v794_v52 = vmul.f32 %v2379_v23, %v2443_v50  ;;  %v731_v11 = vmul.f32 %v2364_v19, %v2387_v26  ;;  %v2780_v35 = vadd.f32 %v791_v33, %v773_v1  ;;  %v775_v10 = vadd.f32 %v761_v58, %v743_v6 }
 0x142   : > { %v2782_v48 = vadd.f32 %v792_v12, %v774_v13  ;;  %v763_v5 = vmul.f32 %v2366_v20, %v2428_v44  ;;  %v744_v39 = vadd.f32 %v730_v56, %v2565_v32  ;;  %v795_v30 = vmul.f32 %v2379_v23, %v2462_v59 }
 0x143   : > { %v745_v0 = vadd.f32 %v731_v11, %v2572_v40  ;;  %v732_v7 = vmul.f32 %v2364_v19, %v2433_v46  ;;  %v2792_v54 = vadd.f32 %v793_v17, %v775_v10  ;;  %v764_v33 = vmul.f32 %v2366_v20, %v2494_v18  ;;  %v3336_v10 = vld [vmem:[#allocation48_spill] sm:$0xff] }
 0x144   : > { %v796_v12 = vmul.f32 %v2379_v23, %v2498_v21  ;;  %v733_v38 = vmul.f32 %v2364_v19, %v2446_v51  ;;  %v776_v32 = vadd.f32 %v762_v31, %v744_v39  ;;  %v765_v37 = vmul.f32 %v2366_v20, %v2484_v15  ;;  %v3337_v39 = vld [vmem:[#allocation49_spill] sm:$0xff] }
 0x145   : > { %v777_v2 = vadd.f32 %v763_v5, %v745_v0  ;;  %v746_v40 = vadd.f32 %v732_v7, %v2628_v28  ;;  %v797_v17 = vmul.f32 %v2379_v23, %v2510_v36  ;;  %v734_v1 = vmul.f32 %v2364_v19, %v2487_v16 }
 0x146   : > { %v747_v58 = vadd.f32 %v733_v38, %v2631_v24  ;;  %v766_v13 = vmul.f32 %v2366_v20, %v2536_v60  ;;  %v2810_v6 = vadd.f32 %v794_v52, %v776_v32  ;;  %v798_v28 = vmul.f32 %v2379_v23, %v2540_v61  ;;  %v3339_v38 = vld [vmem:[#allocation52_spill] sm:$0xff] }
 0x147   : > { %v2812_v56 = vadd.f32 %v795_v30, %v777_v2  ;;  %v778_v31 = vadd.f32 %v764_v33, %v746_v40  ;;  %v748_v24 = vadd.f32 %v734_v1, %v2684_v41  ;;  %v735_v5 = vmul.f32 %v2364_v19, %v3336_v10  ;;  %v3340_v30 = vld [vmem:[#allocation50_spill] sm:$0xff]  ;;  %v3341_v32 = vld [vmem:[#allocation56_spill] sm:$0xff]  ;;  %v3344_v1 = vld [vmem:[#allocation57_spill] sm:$0xff] }
 0x148   : > { %v779_v11 = vadd.f32 %v765_v37, %v747_v58  ;;  %v767_v0 = vmul.f32 %v2366_v20, %v3337_v39  ;;  %v799_v52 = vmul.f32 %v2379_v23, %v3339_v38  ;;  %v736_v33 = vmul.f32 %v2364_v19, %v3340_v30  ;;  %v3343_v37 = vld [vmem:[#allocation65_spill] sm:$0xff] }
 0x149   : > { %v2821_v7 = vadd.f32 %v796_v12, %v778_v31  ;;  %v768_v2 = vmul.f32 %v2366_v20, %v3341_v32  ;;  %v780_v41 = vadd.f32 %v766_v13, %v748_v24  ;;  %v749_v58 = vadd.f32 %v735_v5, %v3343_v37  ;;  %v3345_v31 = vld [vmem:[#allocation51_spill] sm:$0xff]  ;;  %v3349_v13 = vld [vmem:[#allocation54_spill] sm:$0xff]  ;;  %v3350_v24 = vld [vmem:[#allocation60_spill] sm:$0xff] }
 0x14a   : > { %v2829_v40 = vadd.f32 %v797_v17, %v779_v11  ;;  %v800_v4 = vmul.f32 %v2379_v23, %v3344_v1  ;;  %v750_v12 = vadd.f32 %v736_v33, %v2692_v47  ;;  %v737_v57 = vmul.f32 %v2364_v19, %v3345_v31  ;;  %v3351_v47 = vld [vmem:[#allocation66_spill] sm:$0xff]  ;;  %v3353_v1 = vld [vmem:[#allocation55_spill] sm:$0xff] }
 0x14b   : > { %3338 = vst [vmem:[#allocation48_spill] sm:$0xff] %v2821_v7  ;;  %v769_v45 = vmul.f32 %v2366_v20, %v3346_v14  ;;  %v801_v42 = vmul.f32 %v2379_v23, %v3347_v3  ;;  %v2841_v7 = vadd.f32 %v798_v28, %v780_v41  ;;  %v781_v17 = vadd.f32 %v767_v0, %v749_v58  ;;  %v3354_v41 = vld [vmem:[#allocation59_spill] sm:$0xff]  ;;  %v3355_v58 = vld [vmem:[#allocation62_spill] sm:$0xff] }
 0x14c   : > { %3342 = vst [vmem:[#allocation49_spill] sm:$0xff] %v2829_v40  ;;  %v738_v11 = vmul.f32 %v2364_v19, %v3349_v13  ;;  %v770_v5 = vmul.f32 %v2366_v20, %v3350_v24  ;;  %v782_v37 = vadd.f32 %v768_v2, %v750_v12  ;;  %v751_v33 = vadd.f32 %v737_v57, %v3351_v47  ;;  %v3352_v40 = vld [vmem:[#allocation61_spill] sm:$0xff] }
 0x14d   : > { %3348 = vst [vmem:[#allocation52_spill] sm:$0xff] %v2841_v7  ;;  %v802_v31 = vmul.f32 %v2379_v23, %v3352_v40  ;;  %v739_v14 = vmul.f32 %v2364_v19, %v3353_v1  ;;  %v2852_v32 = vadd.f32 %v799_v52, %v781_v17  ;;  %v771_v0 = vmul.f32 %v2366_v20, %v3354_v41  ;;  %v3356_v12 = vld [vmem:[#allocation45_spill] sm:$0xff]  ;;  %v3357_v19 = vld [vmem:[#allocation46_spill] sm:$0xff] }
 0x14e   : > { %v752_v28 = vadd.f32 %v738_v11, %v689_v63  ;;  %v803_v7 = vmul.f32 %v2379_v23, %v3355_v58  ;;  %v2858_v13 = vadd.f32 %v800_v4, %v782_v37  ;;  %v783_v2 = vadd.f32 %v769_v45, %v751_v33  ;;  %v3358_v63 = vld [vmem:[#allocation47_spill] sm:$0xff] }
 0x14f   : > { %v753_v57 = vadd.f32 %v739_v14, %v2763_v55  ;;  %v850_v47 = vmul.f32 %v3356_v12, %v2344_v8  ;;  %v882_v52 = vmul.f32 %v3357_v19, %v2391_v27  ;;  %v914_v17 = vmul.f32 %v3358_v63, %v2377_v22 }
 0x150   : > { %v784_v40 = vadd.f32 %v770_v5, %v752_v28  ;;  %v851_v11 = vmul.f32 %v3356_v12, %v2347_v9  ;;  %v2869_v20 = vadd.f32 %v801_v42, %v783_v2  ;;  %v883_v14 = vmul.f32 %v3357_v19, %v2397_v29 }
 0x151   : > { %v785_v4 = vadd.f32 %v771_v0, %v753_v57  ;;  %v864_v45 = vadd.f32 %v850_v47, %v2733_v43  ;;  %v915_v27 = vmul.f32 %v3358_v63, %v2410_v34  ;;  %v852_v22 = vmul.f32 %v3356_v12, %v2384_v25 }
 0x152   : > { %v816_v55 = vadd.f32 %v802_v31, %v784_v40  ;;  %v865_v8 = vadd.f32 %v851_v11, %v2742_v62  ;;  %v884_v9 = vmul.f32 %v3357_v19, %v2439_v49  ;;  %v916_v42 = vmul.f32 %v3358_v63, %v2443_v50  ;;  %v3360_v11 = vld [vmem:[#allocation57_spill] sm:$0xff] }
 0x153   : > { %v817_v5 = vadd.f32 %v803_v7, %v785_v4  ;;  %v896_v37 = vadd.f32 %v882_v52, %v864_v45  ;;  %v866_v29 = vadd.f32 %v852_v22, %v2769_v53  ;;  %v853_v62 = vmul.f32 %v3356_v12, %v2387_v26  ;;  %v3361_v4 = vld [vmem:[#allocation51_spill] sm:$0xff] }
 0x154   : > { %830 = vst [vmem:[#allocation2 + $0x70] sm:$0xff] %v816_v55  ;;  %v897_v43 = vadd.f32 %v883_v14, %v865_v8  ;;  %v885_v34 = vmul.f32 %v3357_v19, %v2428_v44  ;;  %v917_v7 = vmul.f32 %v3358_v63, %v2462_v59  ;;  %v854_v49 = vmul.f32 %v3356_v12, %v2433_v46  ;;  %v3362_v14 = vld [vmem:[#allocation48_spill] sm:$0xff] }
 0x155   : > { %831 = vst [vmem:[#allocation2 + $0x78] sm:$0xff] %v817_v5  ;;  %v928_v25 = vadd.f32 %v914_v17, %v896_v37  ;;  %v886_v50 = vmul.f32 %v3357_v19, %v2494_v18  ;;  %v898_v31 = vadd.f32 %v884_v9, %v866_v29  ;;  %v867_v53 = vadd.f32 %v853_v62, %v2780_v35  ;;  %v3365_v37 = vld [vmem:[#allocation54_spill] sm:$0xff]  ;;  %v3366_v62 = vld [vmem:[#allocation61_spill] sm:$0xff] }
 0x156   : > { %v929_v40 = vadd.f32 %v915_v27, %v897_v43  ;;  %v918_v26 = vmul.f32 %v3358_v63, %v2498_v21  ;;  %v868_v44 = vadd.f32 %v854_v49, %v2782_v48  ;;  %v855_v33 = vmul.f32 %v3356_v12, %v2446_v51  ;;  %v3364_v27 = vld [vmem:[#allocation49_spill] sm:$0xff] }
 0x157   : > { %942 = vst [vmem:[#allocation2] sm:$0xff] %v928_v25  ;;  %v887_v59 = vmul.f32 %v3357_v19, %v2484_v15  ;;  %v919_v46 = vmul.f32 %v3358_v63, %v2510_v36  ;;  %v930_v18 = vadd.f32 %v916_v42, %v898_v31  ;;  %v899_v28 = vadd.f32 %v885_v34, %v867_v53  ;;  %v3368_v53 = vld [vmem:[#allocation63_spill] sm:$0xff] }
 0x158   : > { %943 = vst [vmem:[#allocation2 + $0x8] sm:$0xff] %v929_v40  ;;  %v856_v35 = vmul.f32 %v3356_v12, %v2487_v16  ;;  %v888_v21 = vmul.f32 %v3357_v19, %v2536_v60  ;;  %v900_v0 = vadd.f32 %v886_v50, %v868_v44  ;;  %v869_v48 = vadd.f32 %v855_v33, %v2792_v54 }
 0x159   : > { %v920_v51 = vmul.f32 %v3358_v63, %v2540_v61  ;;  %v857_v15 = vmul.f32 %v3356_v12, %v3336_v10  ;;  %944 = vst [vmem:[#allocation2 + $0x10] sm:$0xff] %v930_v18  ;;  %v931_v36 = vadd.f32 %v917_v7, %v899_v28  ;;  %v889_v57 = vmul.f32 %v3357_v19, %v3337_v39  ;;  %v3359_v10 = vld [vmem:[#allocation56_spill] sm:$0xff]  ;;  %v3371_v28 = vld [vmem:[#allocation69_spill] sm:$0xff] }
 0x15a   : > { %v870_v2 = vadd.f32 %v856_v35, %v2810_v6  ;;  %v921_v16 = vmul.f32 %v3358_v63, %v3339_v38  ;;  %v932_v60 = vadd.f32 %v918_v26, %v900_v0  ;;  %v901_v47 = vadd.f32 %v887_v59, %v869_v48  ;;  %v3367_v7 = vld [vmem:[#allocation52_spill] sm:$0xff]  ;;  %v3373_v0 = vld [vmem:[#allocation70_spill] sm:$0xff] }
 0x15b   : > { %v871_v54 = vadd.f32 %v857_v15, %v2812_v56  ;;  %v858_v61 = vmul.f32 %v3356_v12, %v3340_v30  ;;  %945 = vst [vmem:[#allocation2 + $0x18] sm:$0xff] %v931_v36  ;;  %v890_v17 = vmul.f32 %v3357_v19, %v3359_v10  ;;  %v922_v6 = vmul.f32 %v3358_v63, %v3360_v11  ;;  %v3363_v56 = vld [vmem:[#allocation53_spill] sm:$0xff]  ;;  %v3369_v26 = vld [vmem:[#allocation68_spill] sm:$0xff] }
 0x15c   : > { %v902_v52 = vadd.f32 %v888_v21, %v870_v2  ;;  %v859_v39 = vmul.f32 %v3356_v12, %v3361_v4  ;;  %946 = vst [vmem:[#allocation2 + $0x20] sm:$0xff] %v932_v60  ;;  %v933_v38 = vadd.f32 %v919_v46, %v901_v47  ;;  %v891_v8 = vmul.f32 %v3357_v19, %v3363_v56  ;;  %v3370_v18 = vld [vmem:[#allocation64_spill] sm:$0xff] }
 0x15d   : > { %v903_v45 = vadd.f32 %v889_v57, %v871_v54  ;;  %v872_v55 = vadd.f32 %v858_v61, %v3362_v14  ;;  %v923_v5 = vmul.f32 %v3358_v63, %v3347_v3  ;;  %v860_v9 = vmul.f32 %v3356_v12, %v3365_v37  ;;  %v3375_v61 = vld [vmem:[#allocation43_spill] sm:$0xff] (!%p1289_p9) }
 0x15e   : > { %v934_v30 = vadd.f32 %v920_v51, %v902_v52  ;;  %v873_v22 = vadd.f32 %v859_v39, %v3364_v27  ;;  %947 = vst [vmem:[#allocation2 + $0x28] sm:$0xff] %v933_v38  ;;  %v892_v29 = vmul.f32 %v3357_v19, %v3350_v24  ;;  %v924_v34 = vmul.f32 %v3358_v63, %v3366_v62  ;;  %v974_v54 = vld [vmem:[#allocation2] sm:$0xff] (!%p1289_p9) }
 0x15f   : > { %v935_v42 = vadd.f32 %v921_v16, %v903_v45  ;;  %v904_v43 = vadd.f32 %v890_v17, %v872_v55  ;;  %v874_v49 = vadd.f32 %v860_v9, %v3367_v7  ;;  %v861_v50 = vmul.f32 %v3356_v12, %v3353_v1  ;;  %v975_v10 = vld [vmem:[#allocation2 + $0x8] sm:$0xff] (!%p1289_p9) }
 0x160   : > { %948 = vst [vmem:[#allocation2 + $0x30] sm:$0xff] %v934_v30  ;;  %v905_v25 = vadd.f32 %v891_v8, %v873_v22  ;;  %v893_v3 = vmul.f32 %v3357_v19, %v3354_v41  ;;  %v925_v31 = vmul.f32 %v3358_v63, %v3355_v58  ;;  %v862_v24 = vmul.f32 %v3356_v12, %v3368_v53  ;;  %v3372_v58 = vld [vmem:[#allocation67_spill] sm:$0xff]  ;;  %v3378_v30 = vld [vmem:[#allocation44_spill] sm:$0xff] (!%p1289_p9) }
 0x161   : > { %949 = vst [vmem:[#allocation2 + $0x38] sm:$0xff] %v935_v42  ;;  %v936_v40 = vadd.f32 %v922_v6, %v904_v43  ;;  %v894_v44 = vmul.f32 %v3357_v19, %v3369_v26  ;;  %v906_v59 = vadd.f32 %v892_v29, %v874_v49  ;;  %v875_v46 = vadd.f32 %v861_v50, %v2852_v32 }
 0x162   : > { %v937_v33 = vadd.f32 %v923_v5, %v905_v25  ;;  %v863_v1 = vmul.f32 %v3356_v12, %v3370_v18  ;;  %v926_v41 = vmul.f32 %v3358_v63, %v3371_v28  ;;  %v876_v35 = vadd.f32 %v862_v24, %v2858_v13 }
 0x163   : > { %950 = vst [vmem:[#allocation2 + $0x40] sm:$0xff] %v936_v40  ;;  %v895_v21 = vmul.f32 %v3357_v19, %v3372_v58  ;;  %v927_v48 = vmul.f32 %v3358_v63, %v3373_v0  ;;  %v938_v51 = vadd.f32 %v924_v34, %v906_v59  ;;  %v907_v15 = vadd.f32 %v893_v3, %v875_v46  ;;  %v960_v19 = vld [vmem:[%s376_s5] sm:$0xff] (!%p1289_p9) }
 0x164   : > { %951 = vst [vmem:[#allocation2 + $0x48] sm:$0xff] %v937_v33  ;;  %v877_v32 = vadd.f32 %v863_v1, %v2869_v20  ;;  %v908_v36 = vadd.f32 %v894_v44, %v876_v35  ;;  %959 = sbr.rel (%p1289_p9) target bundleno = 368 (0x170), region = 60  ;;  %v961_v20 = vld [vmem:[%s376_s5 + $0x8] sm:$0xff] (!%p1289_p9)  ;;  %v962_v13 = vrot.slane (!%p1289_p9), %v960_v19, 7  ;;  %v968_v60 = vrot.slane (!%p1289_p9), %v960_v19, 1 }
 0x165   : > { %952 = vst [vmem:[#allocation2 + $0x50] sm:$0xff] %v938_v51  ;;  %v939_v12 = vadd.f32 %v925_v31, %v907_v15  ;;  %v963_v63 = vrot.slane (!%p1289_p9), %v961_v20, 7  ;;  %v969_v47 = vrot.slane (!%p1289_p9), %v961_v20, 1  ;;  %v976_v52 = vmul.f32 (!%p1289_p9), %v960_v19, %v3375_v61 }
 0x166   : > { %v909_v2 = vadd.f32 %v895_v21, %v877_v32  ;;  %v940_v57 = vadd.f32 %v926_v41, %v908_v36  ;;  %v977_v17 = vmul.f32 (!%p1289_p9), %v961_v20, %v3375_v61 }
 0x167   : > { %953 = vst [vmem:[#allocation2 + $0x58] sm:$0xff] %v939_v12  ;;  %v965_v6 = vsel (!%p1289_p9), %vm490_vm0, %v963_v63, %v962_v13  ;;  %v970_v4 = vsel (!%p1289_p9), %vm542_vm2, %v968_v60, %v969_v47  ;;  %v964_v39 = vsel (!%p1289_p9), %vm490_vm0, %v962_v13, %v963_v63  ;;  %v971_v38 = vsel (!%p1289_p9), %vm542_vm2, %v969_v47, %v968_v60 }
 0x168   : > { %v941_v16 = vadd.f32 %v927_v48, %v909_v2  ;;  %954 = vst [vmem:[#allocation2 + $0x60] sm:$0xff] %v940_v57  ;;  %v966_v45 = vsel (!%p1289_p9), %vm508_vm1, 0.0, %v965_v6  ;;  %v978_v14 = vadd.f32 (!%p1289_p9), %v976_v52, %v974_v54  ;;  %v984_v55 = vmul.f32 (!%p1289_p9), %v970_v4, %v2379_v23 }
 0x169   : > { %v973_v8 = vsel (!%p1289_p9), %vm560_vm3, 0.0, %v971_v38  ;;  %v980_v27 = vmul.f32 (!%p1289_p9), %v966_v45, %v3378_v30  ;;  %v979_v22 = vadd.f32 (!%p1289_p9), %v977_v17, %v975_v10  ;;  %v981_v5 = vmul.f32 (!%p1289_p9), %v964_v39, %v3378_v30 }
 0x16a   : > { %955 = vst [vmem:[#allocation2 + $0x68] sm:$0xff] %v941_v16  ;;  %v985_v37 = vmul.f32 (!%p1289_p9), %v973_v8, %v2379_v23 }
 0x16b   : > { %v982_v9 = vadd.f32 %v980_v27, %v978_v14  ;;  %v983_v42 = vadd.f32 %v981_v5, %v979_v22 }
 0x16d   : > { %v986_v43 = vadd.f32 %v984_v55, %v982_v9  ;;  %v987_v29 = vadd.f32 %v985_v37, %v983_v42 }
 0x16f   : > { %988 = vst [vmem:[#allocation2] sm:$0xff] %v986_v43  ;;  %989 = vst [vmem:[#allocation2 + $0x8] sm:$0xff] %v987_v29 }
 0x170 PF: > { %s3379_s10 = sld [smem:[#allocation26_spill]] }
 0x176   : > { %p1290_p1 = scmp.ge.s32.totalorder %s3379_s10, 1 }
 0x177   : > { %v994_v62 = vld [vmem:[%s385_s6] sm:$0xff] (!%p1290_p1)  ;;  %v995_v34 = vld [vmem:[%s385_s6 + $0x8] sm:$0xff] (!%p1290_p1) }
 0x178   : > { %993 = sbr.rel (%p1290_p1) target bundleno = 388 (0x184), region = 64  ;;  %v996_v25 = vrot.slane (!%p1290_p1), %v994_v62, 7  ;;  %v997_v7 = vrot.slane (!%p1290_p1), %v995_v34, 7  ;;  %v1002_v49 = vrot.slane (!%p1290_p1), %v994_v62, 1  ;;  %v1003_v23 = vrot.slane (!%p1290_p1), %v995_v34, 1  ;;  %v1009_v50 = vld [vmem:[#allocation2 + $0x70] sm:$0xff] (!%p1290_p1) }
 0x179   : > { %v3380_v3 = vld [vmem:[#allocation45_spill] sm:$0xff] (!%p1290_p1)  ;;  %v3382_v1 = vld [vmem:[#allocation47_spill] sm:$0xff] (!%p1290_p1)  ;;  %v3384_v58 = vld [vmem:[#allocation46_spill] sm:$0xff] (!%p1290_p1) }
 0x17a   : > { %v1011_v40 = vmul.f32 (!%p1290_p1), %v994_v62, %v3380_v3  ;;  %v1010_v31 = vld [vmem:[#allocation2 + $0x78] sm:$0xff] (!%p1290_p1)  ;;  %v1012_v53 = vmul.f32 (!%p1290_p1), %v995_v34, %v3380_v3  ;;  %v999_v26 = vsel (!%p1290_p1), %vm490_vm0, %v997_v7, %v996_v25  ;;  %v1004_v44 = vsel (!%p1290_p1), %vm542_vm2, %v1002_v49, %v1003_v23 }
 0x17b   : > { %v998_v33 = vsel (!%p1290_p1), %vm490_vm0, %v996_v25, %v997_v7  ;;  %v1005_v59 = vsel (!%p1290_p1), %vm542_vm2, %v1003_v23, %v1002_v49  ;;  %v1000_v46 = vsel (!%p1290_p1), %vm508_vm1, 0.0, %v999_v26  ;;  %v1019_v28 = vmul.f32 (!%p1290_p1), %v1004_v44, %v3382_v1 }
 0x17c   : > { %v1013_v18 = vadd.f32 (!%p1290_p1), %v1011_v40, %v1009_v50  ;;  %v1007_v35 = vsel (!%p1290_p1), %vm560_vm3, 0.0, %v1005_v59  ;;  %v1015_v21 = vmul.f32 (!%p1290_p1), %v1000_v46, %v3384_v58  ;;  %v1014_v0 = vadd.f32 (!%p1290_p1), %v1012_v53, %v1010_v31 }
 0x17d   : > { %v1016_v48 = vmul.f32 (!%p1290_p1), %v998_v33, %v3384_v58  ;;  %v1020_v51 = vmul.f32 (!%p1290_p1), %v1007_v35, %v3382_v1 }
 0x17e   : > { %v1017_v15 = vadd.f32 (!%p1290_p1), %v1015_v21, %v1013_v18 }
 0x17f   : > { %v1018_v32 = vadd.f32 %v1016_v48, %v1014_v0 }
 0x180   : > { %v1021_v36 = vadd.f32 %v1019_v28, %v1017_v15 }
 0x181   : > { %v1022_v12 = vadd.f32 %v1020_v51, %v1018_v32 }
 0x182   : > { %1023 = vst [vmem:[#allocation2 + $0x70] sm:$0xff] %v1021_v36 }
 0x183   : > { %1024 = vst [vmem:[#allocation2 + $0x78] sm:$0xff] %v1022_v12 }
 0x184 PF: > { %v1025_v2 = vld [vmem:[#allocation2] sm:$0xff]  ;;  %s3385_s2 = sld [smem:[#allocation26_spill]]  ;;  %s3386_s30 = sld [smem:[#allocation27_spill]]  ;;  %v1026_v57 = vld [vmem:[#allocation2 + $0x8] sm:$0xff]  ;;  %v1027_v16 = vld [vmem:[#allocation2 + $0x10] sm:$0xff] }
 0x185   : > { %s3387_s3 = sld [smem:[#allocation28_spill]]  ;;  %1041 = vst [vmem:[%s2963_s18] sm:$0xff] %v1025_v2  ;;  %1042 = vst [vmem:[%s2963_s18 + $0x8] sm:$0xff] %v1026_v57  ;;  %v1028_v19 = vld [vmem:[#allocation2 + $0x18] sm:$0xff]  ;;  %v1029_v20 = vld [vmem:[#allocation2 + $0x20] sm:$0xff]  ;;  %s1075_s7 = sshll.u32 %s2963_s18, 4  ;;  %s3024_s7 = int_to_ptr.vmem [resolvable:$true] %s1075_s7 }
 0x186   : > { %1043 = vst [vmem:[%s2963_s18 + $0x10] sm:$0xff] %v1027_v16  ;;  %v1030_v13 = vld [vmem:[#allocation2 + $0x28] sm:$0xff]  ;;  %1044 = vst [vmem:[%s2963_s18 + $0x18] sm:$0xff] %v1028_v19  ;;  %v1031_v63 = vld [vmem:[#allocation2 + $0x30] sm:$0xff]  ;;  %s3388_s12 = sld [smem:[#allocation39_spill]]  ;;  %s3389_s15 = sld [smem:[#allocation76_spill]] }
 0x187   : > { %1045 = vst [vmem:[%s2963_s18 + $0x20] sm:$0xff] %v1029_v20  ;;  %1046 = vst [vmem:[%s2963_s18 + $0x28] sm:$0xff] %v1030_v13  ;;  %v1032_v60 = vld [vmem:[#allocation2 + $0x38] sm:$0xff]  ;;  %v1033_v47 = vld [vmem:[#allocation2 + $0x40] sm:$0xff]  ;;  %s1058_s4 = scalar_lea.sflag [#allocation5], %s2300_s19  ;;  %s1611_s17 = scalar_lea.vmem %s3024_s7, 2048 }
 0x188   : > { %1047 = vst [vmem:[%s2963_s18 + $0x30] sm:$0xff] %v1031_v63  ;;  %1048 = vst [vmem:[%s2963_s18 + $0x38] sm:$0xff] %v1032_v60  ;;  %v1034_v54 = vld [vmem:[#allocation2 + $0x48] sm:$0xff]  ;;  %v1035_v61 = vld [vmem:[#allocation2 + $0x50] sm:$0xff]  ;;  %p1612_p11 = scmp.ne.s32.totalorder %s3024_s7, %s1611_s17  ;;  %s1820_s27 = smov [#allocation11]  }
 0x189   : > { %1049 = vst [vmem:[%s2963_s18 + $0x40] sm:$0xff] %v1033_v47  ;;  %v1036_v52 = vld [vmem:[#allocation2 + $0x58] sm:$0xff]  ;;  %1050 = vst [vmem:[%s2963_s18 + $0x48] sm:$0xff] %v1034_v54  ;;  %v1037_v10 = vld [vmem:[#allocation2 + $0x60] sm:$0xff]  ;;  %s1615_s25 = sshll.u32 %s1820_s27, 4  ;;  %s1616_s25 = int_to_ptr.vmem [resolvable:$false] %s1615_s25 }
 0x18a   : > { %s1299_s20 = sshll.u32 %s3385_s2, 5  ;;  %1051 = vst [vmem:[%s2963_s18 + $0x50] sm:$0xff] %v1035_v61  ;;  %1052 = vst [vmem:[%s2963_s18 + $0x58] sm:$0xff] %v1036_v52  ;;  %v1038_v17 = vld [vmem:[#allocation2 + $0x68] sm:$0xff]  ;;  %v1039_v11 = vld [vmem:[#allocation2 + $0x70] sm:$0xff]  ;;  %s1617_s22 = scalar_lea.vmem %s1616_s25, 4096 }
 0x18b   : > { %s1070_s5 = sadd.s32 %s3386_s30, %s1299_s20  ;;  %s1294_s21 = sshll.u32 %s3387_s3, 6  ;;  %1053 = vst [vmem:[%s2963_s18 + $0x60] sm:$0xff] %v1037_v10  ;;  %1054 = vst [vmem:[%s2963_s18 + $0x68] sm:$0xff] %v1038_v17  ;;  %v1040_v6 = vld [vmem:[#allocation2 + $0x78] sm:$0xff] }
 0x18c   : > { %s1072_s13 = sadd.s32 %s1294_s21, %s1070_s5  ;;  %1055 = vst [vmem:[%s2963_s18 + $0x70] sm:$0xff] %v1039_v11  ;;  %1056 = vst [vmem:[%s2963_s18 + $0x78] sm:$0xff] %v1040_v6  ;;  %p3390_p4 = scmp.ne.s32.totalorder %s3388_s12, 0 }
 0x18d   : > { %s1295_s6 = sshll.u32 %s1072_s13, 7  ;;  %p1618_p2 = scmp.lt.s32.totalorder %s3024_s7, %s1616_s25 }
 0x18e   : > { %s3032_s24 = scalar_lea.hbm %s3389_s15, %s1295_s6  ;;  %p1613_p12 = pnand %p1612_p11, %p3390_p4 }
 0x18f   : > { %p1619_p7 = scmp.lt.s32.totalorder %s1617_s22, %s1611_s17 }
 0x190   : > { %p1614_p5 = pneg %p1613_p12 }
 0x191   : > { %p1620_p13 = por %p1619_p7, %p1618_p2 }
 0x193   : > { %p1621_p6 = pnand %p1620_p13, %p1614_p5 }
 0x195   : > { %1624 = shalt.err (!%p1621_p6)
}
 0x196   : > { %s1625_s18 = scalar_lea.hbm %s3032_s24, 2048  ;;  %s1629_s2 = scalar_lea.hbm %s3389_s15, 16384 }
 0x197   : > { %p1626_p3 = scmp.ne.s32.totalorder %s3032_s24, %s1625_s18  ;;  %p1630_p8 = scmp.lt.u32.totalorder %s3032_s24, %s3389_s15 }
 0x198   : > { %p1631_p9 = scmp.lt.u32.totalorder %s1629_s2, %s1625_s18  ;;  %p1633_p11 = scmp.lt.u32.totalorder %s1625_s18, %s3032_s24 }
 0x199   : > { %p1627_p0 = pnand %p1626_p3, %p3390_p4 }
 0x19a   : > { %p1632_p1 = por %p1631_p9, %p1630_p8 }
 0x19b   : > { %p1628_p10 = pneg %p1627_p0 }
 0x19c   : > { %p1634_p12 = por %p1633_p11, %p1632_p1 }
 0x19e   : > { %p1635_p5 = pnand %p1634_p12, %p1628_p10 }
 0x1a0   : > { %1638 = shalt.err (!%p1635_p5)
}
 0x1a1   : > { %s1821_s20 = smov 128   ;;  %s1822_s5 = smov 256  }
 0x1a2   : > { %s1823_s21 = smov 8  }
 0x1a3   : > { %1310 = dma.vmem_to_hbm [thread:$0]  (%p3390_p4), %s3024_s7, 2048, %s3032_s24, %s1058_s4, %s1821_s20, %s1822_s5, %s1823_s21  }
 0x1a4 PF: > { %s3391_s13 = sld [smem:[#allocation24_spill]]  ;;  %p1330_p2 = scmp.ge.s32.totalorder %s1809_s11, 2 }
 0x1a5   : > { %s3392_s6 = sld [smem:[#allocation40_spill]] }
 0x1aa   : > { %s1090_s8 = sand.u32 1, %s3391_s13  }
 0x1ab   : > { %p3393_p7 = scmp.ne.s32.totalorder %s3392_s6, 0  ;;  %s1091_s26 = scalar_lea.sflag [#allocation5], %s1090_s8 }
 0x1ad   : > { %p1326_p13 = pnand %p1330_p2, %p3393_p7 }
 0x1af   : > { %1732 = dma.done.wait (!%p1326_p13), %s1091_s26, 2048  }
 0x1b0   : > { %1734 = vsyncadd (!%p1326_p13), %s1091_s26, 4294965248  ;;  %s27_s11 = sadd.s32 1, %s1809_s11   ;;  %s3395_s18 = sld [smem:[#allocation18_spill]] }
 0x1b1   : > { %p3067_p6 = scmp.ge.s32.totalorder %s27_s11, 10   ;;  %s3396_s19 = sld [smem:[#allocation19_spill]] }
 0x1b2   : > { %s3397_s21 = sld [smem:[#allocation21_spill]]  ;;  %s3398_s24 = sld [smem:[#allocation22_spill]] }
 0x1b3   : > { %s3399_s25 = sld [smem:[#allocation23_spill]]  ;;  %s3400_s26 = sld [smem:[#allocation36_spill]] }
 0x1b4   : > { %s3401_s7 = sld [smem:[#allocation25_spill]]  ;;  %s3402_s29 = sld [smem:[#allocation37_spill]] }
 0x1b5   : > { %s3403_s30 = sld [smem:[#allocation29_spill]]  ;;  %s3404_s12 = sld [smem:[#allocation30_spill]] }
 0x1b6   : > { %s3405_s8 = sld [smem:[#allocation31_spill]]  ;;  %s3406_s4 = sld [smem:[#allocation32_spill]] }
 0x1b7   : > { %s3407_s10 = sld [smem:[#allocation33_spill]]  ;;  %s3408_s20 = smov %s2241_s0 }
 0x1b8   : > { %s3409_s22 = smov %s1757_s23  ;;  %s3410_s23 = smov %s2188_s14 }
 0x1b9   : > { %s3411_s27 = smov %s1777_s28  ;;  %s3413_s6 = smov %s1801_s9 }
 0x1ba   : > { %s3412_s28 = smov %s3401_s7  ;;  %26 = sbr.rel (!%p3067_p6) target bundleno = 24 (0x18), region = 135 }
 0x1bb   : > { %s3414_s7 = smov %s3404_s12 }
 0x1bc   : > { %s3415_s9 = smov %s3406_s4 }
 0x1c1   :  { %1096 = vsyncpa [#allocation4], 1 }
 0x1c2   :  { %1098 = vsyncpa [#allocation4 + $0x1], 1 }
 0x1c3   :  { %1099 = vsyncpa [#allocation7], 1 }
 0x1c4   :  { %1101 = vsyncpa [#allocation7 + $0x1], 1 }
 0x1c5   :  { %1102 = vsyncpa [#allocation10], 1 }
 0x1c6   :  { %1104 = vsyncpa [#allocation10 + $0x1], 1 }
 0x1c7   :  { %1105 = vsyncpa [#allocation5], 1 }
 0x1c8   :  { %1107 = vsyncpa [#allocation5 + $0x1], 1 }

</bundles_post_ra>
